<compile_context>
chip_gen: v5e
topology: v5e:2x2
jax: 0.10.0
libtpu: 0.0.40
codegen_flags: <defaults>
</compile_context>

<pallas_src>
import jax
import jax.numpy as jnp
from jax.experimental import pallas as pl
from jax.experimental.pallas import tpu as pltpu


# ----------------- fused conv+fc kernel (whole batch, one grid step) ---------
def _siamese_fused_kernel(patch_ref, wc_ref, bc_ref, w1_ref, b1_ref,
                          w2_ref, b2_ref, o_ref, conv_scr):
    # patch_ref: [9*Cin, B*H*W]   im2col slab for the whole batch (lane dense)
    # wc_ref   : [Cout, 9*Cin]    conv weights (MXU LHS)
    # bc_ref   : [Cout, 1]        conv bias
    # w1_ref   : [Cout, H*W, hidden]  fc1 weight, pre-reshaped to flatten order
    # b1_ref   : [1, hidden]
    # w2_ref   : [hidden, out_dim]
    # b2_ref   : [1, out_dim]
    # o_ref    : [2, rows, out_dim]   final stacked siamese output
    # conv_scr : [Cout, B, H*W]   VMEM repack buffer
    cout, n_b, hw = conv_scr.shape
    hidden = b1_ref.shape[-1]
    rows = o_ref.shape[1]

    # conv for the whole batch as ONE MXU matmul, then bias + ReLU (in vregs).
    conv = jnp.dot(wc_ref[...], patch_ref[...],
                   preferred_element_type=jnp.float32)          # [Cout, B*HW]
    conv = jnp.maximum(conv + bc_ref[...], 0.0)

    # Repack [Cout, B*HW] -> [Cout, B, HW] through VMEM scratch using only
    # aligned static lane slices (no in-register minor-dim reshape).
    for b in range(n_b):                                        # B=4, static
        conv_scr[:, b, :] = conv[:, b * hw:(b + 1) * hw]

    # fc1 in torch flatten order (o, h, w):
    #   y1[b, n] = sum_o conv[o, b*HW:(b+1)*HW] @ w1[o*HW:(o+1)*HW, n]
    # -> Cout batched MXU dots of (B, HW) @ (HW, hidden), accumulated in f32.
    y1 = jnp.zeros((n_b, hidden), jnp.float32)
    for o in range(cout):                                       # Cout=8, static
        y1 = y1 + jnp.dot(conv_scr[o], w1_ref[o],
                          preferred_element_type=jnp.float32)
    y1 = jnp.maximum(y1 + b1_ref[...], 0.0)                     # fc1 bias + ReLU

    # fc2 (no ReLU) + split into the two siamese halves: torch.stack((o1,o2),0)
    y2 = jnp.dot(y1, w2_ref[...],
                 preferred_element_type=jnp.float32) + b2_ref[...]   # [B, out]
    o_ref[0] = y2[:rows]
    o_ref[1] = y2[rows:]


# ------------------------------ forward pass ----------------------------------
def siamese_forward(i, p):
    """conv3x3(pad=1)+ReLU -> flatten -> Linear+ReLU -> Linear on both halves."""
    B, cin, H, W = i.shape
    rows = B // 2
    # torch.squeeze(x, 0) is a no-op for rows >= 2, which is the case exercised.
    # TODO(synk): the rows == 1 unbatched path (3-D conv input) is not modeled.
    cout = p["conv_w"].shape[0]
    hw = H * W
    hidden = p["b1"].shape[0]
    out_dim = p["b2"].shape[0]

    # im2col in XLA (tiny, one fusion):
    #   patches[tap*Cin + c, b*HW + h*W + w] = xpad[b, c, h+dy, w+dx]
    xp = jnp.pad(i, ((0, 0), (0, 0), (1, 1), (1, 1)))
    taps = [xp[:, :, dy:dy + H, dx:dx + W] for dy in range(3) for dx in range(3)]
    patches = (jnp.stack(taps, axis=0)              # [9, B, Cin, H, W]
               .transpose(0, 2, 1, 3, 4)            # [9, Cin, B, H, W]
               .reshape(9 * cin, B * hw))

    # weight plumbing (layout only, done in XLA once per call):
    w_col = jnp.transpose(p["conv_w"], (0, 2, 3, 1)).reshape(cout, 9 * cin)
    bc = p["conv_b"].reshape(cout, 1)
    w1r = p["w1_t"].reshape(cout, hw, hidden)       # flat index = o*H*W + h*W + w
    b1 = p["b1"].reshape(1, hidden)
    w2 = p["w2_t"]
    b2 = p["b2"].reshape(1, out_dim)

    out = pl.pallas_call(
        _siamese_fused_kernel,
        out_shape=jax.ShapeDtypeStruct((2, rows, out_dim), jnp.float32),
        grid=(1,),
        in_specs=[
            pl.BlockSpec((9 * cin, B * hw), lambda g: (0, 0)),      # im2col slab
            pl.BlockSpec((cout, 9 * cin), lambda g: (0, 0)),        # conv weights
            pl.BlockSpec((cout, 1), lambda g: (0, 0)),
            pl.BlockSpec((cout, hw, hidden), lambda g: (0, 0, 0)),  # fc1 weights
            pl.BlockSpec((1, hidden), lambda g: (0, 0)),
            pl.BlockSpec((hidden, out_dim), lambda g: (0, 0)),      # fc2 weights
            pl.BlockSpec((1, out_dim), lambda g: (0, 0)),
        ],
        out_specs=pl.BlockSpec((2, rows, out_dim), lambda g: (0, 0, 0)),
        scratch_shapes=[pltpu.VMEM((cout, B, hw), jnp.float32)],
        compiler_params=pltpu.CompilerParams(
            dimension_semantics=("arbitrary",)),
    )(patches, w_col, bc, w1r, b1, w2, b2)
    return out
    # self.output (Softsign) is never used in the reference forward -> not applied.


# ------------------------------ params ----------------------------------------
def init_params(key, cin=4, cout=8, h=16, w=16, hidden=32, out_dim=16):
    ks = jax.random.split(key, 6)
    flat = cout * h * w
    return dict(
        conv_w=jax.random.normal(ks[0], (cout, cin, 3, 3), jnp.float32) * 0.05,
        conv_b=jax.random.normal(ks[1], (cout,), jnp.float32) * 0.05,
        w1_t=jax.random.normal(ks[2], (flat, hidden), jnp.float32) / jnp.sqrt(flat),
        b1=jax.random.normal(ks[3], (hidden,), jnp.float32) * 0.05,
        w2_t=jax.random.normal(ks[4], (hidden, out_dim), jnp.float32) / jnp.sqrt(hidden),
        b2=jax.random.normal(ks[5], (out_dim,), jnp.float32) * 0.05,
    )


# --------------------------- pure-JAX reference -------------------------------
def reference_forward(i, p):
    def fwd_once(x):
        y = jax.lax.conv_general_dilated(
            x, p["conv_w"], window_strides=(1, 1), padding=((1, 1), (1, 1)),
            dimension_numbers=("NCHW", "OIHW", "NCHW"),
            precision=jax.lax.Precision.HIGHEST)
        y = jnp.maximum(y + p["conv_b"][None, :, None, None], 0.0)
        y = y.reshape(y.shape[0], -1)
        y = jnp.maximum(
            jnp.dot(y, p["w1_t"], precision=jax.lax.Precision.HIGHEST) + p["b1"], 0.0)
        y = jnp.dot(y, p["w2_t"], precision=jax.lax.Precision.HIGHEST) + p["b2"]
        return y

    rows = i.shape[0] // 2
    return jnp.stack((fwd_once(i[:rows]), fwd_once(i[rows:])), axis=0)


if __name__ == "__main__":
    key = jax.random.PRNGKey(0)
    k_params, k_x = jax.random.split(key)
    params = init_params(k_params)

    # Input: batch 4 (-> two siamese branches of 2), 4 channels, 16x16 spatial.
    x = jax.random.normal(k_x, (4, 4, 16, 16), jnp.float32)

    out = jax.jit(siamese_forward)(x, params)
    out = jax.block_until_ready(out)
    assert out.shape == (2, 2, 16), out.shape

    ref = jax.block_until_ready(reference_forward(x, params))
    max_err = float(jnp.max(jnp.abs(out - ref)))
    assert max_err < 5e-3, f"mismatch vs reference: {max_err}"

    print("KERNEL_OK")
</pallas_src>

<mosaic_0001>
module attributes {stable_mosaic.version = 11 : i64} {
  func.func @_siamese_fused_kernel(%arg0: i32, %arg1: memref<36x1024xf32, #tpu.memory_space<vmem>>, %arg2: memref<8x36xf32, #tpu.memory_space<vmem>>, %arg3: memref<8x1xf32, #tpu.memory_space<vmem>>, %arg4: memref<8x256x32xf32, #tpu.memory_space<vmem>>, %arg5: memref<1x32xf32, #tpu.memory_space<vmem>>, %arg6: memref<32x16xf32, #tpu.memory_space<vmem>>, %arg7: memref<1x16xf32, #tpu.memory_space<vmem>>, %arg8: memref<2x2x16xf32, #tpu.memory_space<vmem>>, %arg9: memref<8x4x256xf32, #tpu.memory_space<vmem>>) attributes {dimension_semantics = [#tpu.dimension_semantics<arbitrary>], iteration_bounds = array<i64: 1>, scalar_prefetch = 0 : i64, scratch_operands = 1 : i64, tpu.core_type = #tpu.core_type<tc>, window_params = [{pipeline_mode = #tpu.pipeline_mode<synchronous>, transform_indices = @transform_0, window_bounds = array<i64: 36, 1024>}, {pipeline_mode = #tpu.pipeline_mode<synchronous>, transform_indices = @transform_1, window_bounds = array<i64: 8, 36>}, {pipeline_mode = #tpu.pipeline_mode<synchronous>, transform_indices = @transform_2, window_bounds = array<i64: 8, 1>}, {pipeline_mode = #tpu.pipeline_mode<synchronous>, transform_indices = @transform_3, window_bounds = array<i64: 8, 256, 32>}, {pipeline_mode = #tpu.pipeline_mode<synchronous>, transform_indices = @transform_4, window_bounds = array<i64: 1, 32>}, {pipeline_mode = #tpu.pipeline_mode<synchronous>, transform_indices = @transform_5, window_bounds = array<i64: 32, 16>}, {pipeline_mode = #tpu.pipeline_mode<synchronous>, transform_indices = @transform_6, window_bounds = array<i64: 1, 16>}, {pipeline_mode = #tpu.pipeline_mode<synchronous>, transform_indices = @transform_7, window_bounds = array<i64: 2, 2, 16>}]} {
    %c0 = arith.constant 0 : index
    %c0_0 = arith.constant 0 : index
    %0 = vector.load %arg2[%c0, %c0_0] : memref<8x36xf32, #tpu.memory_space<vmem>>, vector<8x36xf32>
    %c0_1 = arith.constant 0 : index
    %c0_2 = arith.constant 0 : index
    %1 = vector.load %arg1[%c0_1, %c0_2] : memref<36x1024xf32, #tpu.memory_space<vmem>>, vector<36x1024xf32>
    %cst = arith.constant dense<0.000000e+00> : vector<8x1024xf32>
    %2 = tpu.matmul %0, %1, %cst {dimension_numbers = #tpu.dot_dimension_numbers<[1], [0], [0], [1], [0, 0, 1, 1], [], []>} : vector<8x36xf32>, vector<36x1024xf32>, vector<8x1024xf32> -> vector<8x1024xf32>
    %c0_3 = arith.constant 0 : index
    %c0_4 = arith.constant 0 : index
    %3 = vector.load %arg3[%c0_3, %c0_4] : memref<8x1xf32, #tpu.memory_space<vmem>>, vector<8x1xf32>
    %4 = vector.broadcast %3 : vector<8x1xf32> to vector<8x1024xf32>
    %5 = arith.addf %2, %4 : vector<8x1024xf32>
    %cst_5 = arith.constant 0.000000e+00 : f32
    %6 = vector.broadcast %cst_5 : f32 to vector<8x1024xf32>
    %7 = arith.maximumf %5, %6 : vector<8x1024xf32>
    %8 = vector.extract_strided_slice %7 {offsets = [0, 0], sizes = [8, 256], strides = [1, 1]} : vector<8x1024xf32> to vector<8x256xf32>
    %c0_6 = arith.constant 0 : index
    %c0_7 = arith.constant 0 : index
    %c0_8 = arith.constant 0 : index
    %9 = vector.load %arg9[%c0_6, %c0_7, %c0_8] : memref<8x4x256xf32, #tpu.memory_space<vmem>>, vector<8x1x256xf32>
    %10 = vector.shape_cast %9 : vector<8x1x256xf32> to vector<8x256xf32>
    %11 = vector.shape_cast %8 : vector<8x256xf32> to vector<8x1x256xf32>
    tpu.vector_store %arg9[%c0_6, %c0_7, %c0_8], %11 {strides = array<i32>} : memref<8x4x256xf32, #tpu.memory_space<vmem>>, vector<8x1x256xf32>,
    %12 = vector.extract_strided_slice %7 {offsets = [0, 256], sizes = [8, 256], strides = [1, 1]} : vector<8x1024xf32> to vector<8x256xf32>
    %c0_9 = arith.constant 0 : index
    %c1 = arith.constant 1 : index
    %c0_10 = arith.constant 0 : index
    %13 = vector.load %arg9[%c0_9, %c1, %c0_10] : memref<8x4x256xf32, #tpu.memory_space<vmem>>, vector<8x1x256xf32>
    %14 = vector.shape_cast %13 : vector<8x1x256xf32> to vector<8x256xf32>
    %15 = vector.shape_cast %12 : vector<8x256xf32> to vector<8x1x256xf32>
    tpu.vector_store %arg9[%c0_9, %c1, %c0_10], %15 {strides = array<i32>} : memref<8x4x256xf32, #tpu.memory_space<vmem>>, vector<8x1x256xf32>,
    %16 = vector.extract_strided_slice %7 {offsets = [0, 512], sizes = [8, 256], strides = [1, 1]} : vector<8x1024xf32> to vector<8x256xf32>
    %c0_11 = arith.constant 0 : index
    %c2 = arith.constant 2 : index
    %c0_12 = arith.constant 0 : index
    %17 = vector.load %arg9[%c0_11, %c2, %c0_12] : memref<8x4x256xf32, #tpu.memory_space<vmem>>, vector<8x1x256xf32>
    %18 = vector.shape_cast %17 : vector<8x1x256xf32> to vector<8x256xf32>
    %19 = vector.shape_cast %16 : vector<8x256xf32> to vector<8x1x256xf32>
    tpu.vector_store %arg9[%c0_11, %c2, %c0_12], %19 {strides = array<i32>} : memref<8x4x256xf32, #tpu.memory_space<vmem>>, vector<8x1x256xf32>,
    %20 = vector.extract_strided_slice %7 {offsets = [0, 768], sizes = [8, 256], strides = [1, 1]} : vector<8x1024xf32> to vector<8x256xf32>
    %c0_13 = arith.constant 0 : index
    %c3 = arith.constant 3 : index
    %c0_14 = arith.constant 0 : index
    %21 = vector.load %arg9[%c0_13, %c3, %c0_14] : memref<8x4x256xf32, #tpu.memory_space<vmem>>, vector<8x1x256xf32>
    %22 = vector.shape_cast %21 : vector<8x1x256xf32> to vector<8x256xf32>
    %23 = vector.shape_cast %20 : vector<8x256xf32> to vector<8x1x256xf32>
    tpu.vector_store %arg9[%c0_13, %c3, %c0_14], %23 {strides = array<i32>} : memref<8x4x256xf32, #tpu.memory_space<vmem>>, vector<8x1x256xf32>,
    %cst_15 = arith.constant 0.000000e+00 : f32
    %24 = vector.broadcast %cst_15 : f32 to vector<4x32xf32>
    %c0_16 = arith.constant 0 : index
    %c0_17 = arith.constant 0 : index
    %c0_18 = arith.constant 0 : index
    %25 = vector.load %arg9[%c0_16, %c0_17, %c0_18] : memref<8x4x256xf32, #tpu.memory_space<vmem>>, vector<1x4x256xf32>
    %26 = vector.shape_cast %25 : vector<1x4x256xf32> to vector<4x256xf32>
    %c0_19 = arith.constant 0 : index
    %c0_20 = arith.constant 0 : index
    %c0_21 = arith.constant 0 : index
    %27 = vector.load %arg4[%c0_19, %c0_20, %c0_21] : memref<8x256x32xf32, #tpu.memory_space<vmem>>, vector<1x256x32xf32>
    %28 = vector.shape_cast %27 : vector<1x256x32xf32> to vector<256x32xf32>
    %cst_22 = arith.constant dense<0.000000e+00> : vector<4x32xf32>
    %29 = tpu.matmul %26, %28, %cst_22 {dimension_numbers = #tpu.dot_dimension_numbers<[1], [0], [0], [1], [0, 0, 1, 1], [], []>} : vector<4x256xf32>, vector<256x32xf32>, vector<4x32xf32> -> vector<4x32xf32>
    %30 = arith.addf %24, %29 : vector<4x32xf32>
    %c1_23 = arith.constant 1 : index
    %c0_24 = arith.constant 0 : index
    %c0_25 = arith.constant 0 : index
    %31 = vector.load %arg9[%c1_23, %c0_24, %c0_25] : memref<8x4x256xf32, #tpu.memory_space<vmem>>, vector<1x4x256xf32>
    %32 = vector.shape_cast %31 : vector<1x4x256xf32> to vector<4x256xf32>
    %c1_26 = arith.constant 1 : index
    %c0_27 = arith.constant 0 : index
    %c0_28 = arith.constant 0 : index
    %33 = vector.load %arg4[%c1_26, %c0_27, %c0_28] : memref<8x256x32xf32, #tpu.memory_space<vmem>>, vector<1x256x32xf32>
    %34 = vector.shape_cast %33 : vector<1x256x32xf32> to vector<256x32xf32>
    %cst_29 = arith.constant dense<0.000000e+00> : vector<4x32xf32>
    %35 = tpu.matmul %32, %34, %cst_29 {dimension_numbers = #tpu.dot_dimension_numbers<[1], [0], [0], [1], [0, 0, 1, 1], [], []>} : vector<4x256xf32>, vector<256x32xf32>, vector<4x32xf32> -> vector<4x32xf32>
    %36 = arith.addf %30, %35 : vector<4x32xf32>
    %c2_30 = arith.constant 2 : index
    %c0_31 = arith.constant 0 : index
    %c0_32 = arith.constant 0 : index
    %37 = vector.load %arg9[%c2_30, %c0_31, %c0_32] : memref<8x4x256xf32, #tpu.memory_space<vmem>>, vector<1x4x256xf32>
    %38 = vector.shape_cast %37 : vector<1x4x256xf32> to vector<4x256xf32>
    %c2_33 = arith.constant 2 : index
    %c0_34 = arith.constant 0 : index
    %c0_35 = arith.constant 0 : index
    %39 = vector.load %arg4[%c2_33, %c0_34, %c0_35] : memref<8x256x32xf32, #tpu.memory_space<vmem>>, vector<1x256x32xf32>
    %40 = vector.shape_cast %39 : vector<1x256x32xf32> to vector<256x32xf32>
    %cst_36 = arith.constant dense<0.000000e+00> : vector<4x32xf32>
    %41 = tpu.matmul %38, %40, %cst_36 {dimension_numbers = #tpu.dot_dimension_numbers<[1], [0], [0], [1], [0, 0, 1, 1], [], []>} : vector<4x256xf32>, vector<256x32xf32>, vector<4x32xf32> -> vector<4x32xf32>
    %42 = arith.addf %36, %41 : vector<4x32xf32>
    %c3_37 = arith.constant 3 : index
    %c0_38 = arith.constant 0 : index
    %c0_39 = arith.constant 0 : index
    %43 = vector.load %arg9[%c3_37, %c0_38, %c0_39] : memref<8x4x256xf32, #tpu.memory_space<vmem>>, vector<1x4x256xf32>
    %44 = vector.shape_cast %43 : vector<1x4x256xf32> to vector<4x256xf32>
    %c3_40 = arith.constant 3 : index
    %c0_41 = arith.constant 0 : index
    %c0_42 = arith.constant 0 : index
    %45 = vector.load %arg4[%c3_40, %c0_41, %c0_42] : memref<8x256x32xf32, #tpu.memory_space<vmem>>, vector<1x256x32xf32>
    %46 = vector.shape_cast %45 : vector<1x256x32xf32> to vector<256x32xf32>
    %cst_43 = arith.constant dense<0.000000e+00> : vector<4x32xf32>
    %47 = tpu.matmul %44, %46, %cst_43 {dimension_numbers = #tpu.dot_dimension_numbers<[1], [0], [0], [1], [0, 0, 1, 1], [], []>} : vector<4x256xf32>, vector<256x32xf32>, vector<4x32xf32> -> vector<4x32xf32>
    %48 = arith.addf %42, %47 : vector<4x32xf32>
    %c4 = arith.constant 4 : index
    %c0_44 = arith.constant 0 : index
    %c0_45 = arith.constant 0 : index
    %49 = vector.load %arg9[%c4, %c0_44, %c0_45] : memref<8x4x256xf32, #tpu.memory_space<vmem>>, vector<1x4x256xf32>
    %50 = vector.shape_cast %49 : vector<1x4x256xf32> to vector<4x256xf32>
    %c4_46 = arith.constant 4 : index
    %c0_47 = arith.constant 0 : index
    %c0_48 = arith.constant 0 : index
    %51 = vector.load %arg4[%c4_46, %c0_47, %c0_48] : memref<8x256x32xf32, #tpu.memory_space<vmem>>, vector<1x256x32xf32>
    %52 = vector.shape_cast %51 : vector<1x256x32xf32> to vector<256x32xf32>
    %cst_49 = arith.constant dense<0.000000e+00> : vector<4x32xf32>
    %53 = tpu.matmul %50, %52, %cst_49 {dimension_numbers = #tpu.dot_dimension_numbers<[1], [0], [0], [1], [0, 0, 1, 1], [], []>} : vector<4x256xf32>, vector<256x32xf32>, vector<4x32xf32> -> vector<4x32xf32>
    %54 = arith.addf %48, %53 : vector<4x32xf32>
    %c5 = arith.constant 5 : index
    %c0_50 = arith.constant 0 : index
    %c0_51 = arith.constant 0 : index
    %55 = vector.load %arg9[%c5, %c0_50, %c0_51] : memref<8x4x256xf32, #tpu.memory_space<vmem>>, vector<1x4x256xf32>
    %56 = vector.shape_cast %55 : vector<1x4x256xf32> to vector<4x256xf32>
    %c5_52 = arith.constant 5 : index
    %c0_53 = arith.constant 0 : index
    %c0_54 = arith.constant 0 : index
    %57 = vector.load %arg4[%c5_52, %c0_53, %c0_54] : memref<8x256x32xf32, #tpu.memory_space<vmem>>, vector<1x256x32xf32>
    %58 = vector.shape_cast %57 : vector<1x256x32xf32> to vector<256x32xf32>
    %cst_55 = arith.constant dense<0.000000e+00> : vector<4x32xf32>
    %59 = tpu.matmul %56, %58, %cst_55 {dimension_numbers = #tpu.dot_dimension_numbers<[1], [0], [0], [1], [0, 0, 1, 1], [], []>} : vector<4x256xf32>, vector<256x32xf32>, vector<4x32xf32> -> vector<4x32xf32>
    %60 = arith.addf %54, %59 : vector<4x32xf32>
    %c6 = arith.constant 6 : index
    %c0_56 = arith.constant 0 : index
    %c0_57 = arith.constant 0 : index
    %61 = vector.load %arg9[%c6, %c0_56, %c0_57] : memref<8x4x256xf32, #tpu.memory_space<vmem>>, vector<1x4x256xf32>
    %62 = vector.shape_cast %61 : vector<1x4x256xf32> to vector<4x256xf32>
    %c6_58 = arith.constant 6 : index
    %c0_59 = arith.constant 0 : index
    %c0_60 = arith.constant 0 : index
    %63 = vector.load %arg4[%c6_58, %c0_59, %c0_60] : memref<8x256x32xf32, #tpu.memory_space<vmem>>, vector<1x256x32xf32>
    %64 = vector.shape_cast %63 : vector<1x256x32xf32> to vector<256x32xf32>
    %cst_61 = arith.constant dense<0.000000e+00> : vector<4x32xf32>
    %65 = tpu.matmul %62, %64, %cst_61 {dimension_numbers = #tpu.dot_dimension_numbers<[1], [0], [0], [1], [0, 0, 1, 1], [], []>} : vector<4x256xf32>, vector<256x32xf32>, vector<4x32xf32> -> vector<4x32xf32>
    %66 = arith.addf %60, %65 : vector<4x32xf32>
    %c7 = arith.constant 7 : index
    %c0_62 = arith.constant 0 : index
    %c0_63 = arith.constant 0 : index
    %67 = vector.load %arg9[%c7, %c0_62, %c0_63] : memref<8x4x256xf32, #tpu.memory_space<vmem>>, vector<1x4x256xf32>
    %68 = vector.shape_cast %67 : vector<1x4x256xf32> to vector<4x256xf32>
    %c7_64 = arith.constant 7 : index
    %c0_65 = arith.constant 0 : index
    %c0_66 = arith.constant 0 : index
    %69 = vector.load %arg4[%c7_64, %c0_65, %c0_66] : memref<8x256x32xf32, #tpu.memory_space<vmem>>, vector<1x256x32xf32>
    %70 = vector.shape_cast %69 : vector<1x256x32xf32> to vector<256x32xf32>
    %cst_67 = arith.constant dense<0.000000e+00> : vector<4x32xf32>
    %71 = tpu.matmul %68, %70, %cst_67 {dimension_numbers = #tpu.dot_dimension_numbers<[1], [0], [0], [1], [0, 0, 1, 1], [], []>} : vector<4x256xf32>, vector<256x32xf32>, vector<4x32xf32> -> vector<4x32xf32>
    %72 = arith.addf %66, %71 : vector<4x32xf32>
    %c0_68 = arith.constant 0 : index
    %c0_69 = arith.constant 0 : index
    %73 = vector.load %arg5[%c0_68, %c0_69] : memref<1x32xf32, #tpu.memory_space<vmem>>, vector<1x32xf32>
    %74 = vector.broadcast %73 : vector<1x32xf32> to vector<4x32xf32>
    %75 = arith.addf %72, %74 : vector<4x32xf32>
    %cst_70 = arith.constant 0.000000e+00 : f32
    %76 = vector.broadcast %cst_70 : f32 to vector<4x32xf32>
    %77 = arith.maximumf %75, %76 : vector<4x32xf32>
    %c0_71 = arith.constant 0 : index
    %c0_72 = arith.constant 0 : index
    %78 = vector.load %arg6[%c0_71, %c0_72] : memref<32x16xf32, #tpu.memory_space<vmem>>, vector<32x16xf32>
    %cst_73 = arith.constant dense<0.000000e+00> : vector<4x16xf32>
    %79 = tpu.matmul %77, %78, %cst_73 {dimension_numbers = #tpu.dot_dimension_numbers<[1], [0], [0], [1], [0, 0, 1, 1], [], []>} : vector<4x32xf32>, vector<32x16xf32>, vector<4x16xf32> -> vector<4x16xf32>
    %c0_74 = arith.constant 0 : index
    %c0_75 = arith.constant 0 : index
    %80 = vector.load %arg7[%c0_74, %c0_75] : memref<1x16xf32, #tpu.memory_space<vmem>>, vector<1x16xf32>
    %81 = vector.broadcast %80 : vector<1x16xf32> to vector<4x16xf32>
    %82 = arith.addf %79, %81 : vector<4x16xf32>
    %83 = vector.extract_strided_slice %82 {offsets = [0, 0], sizes = [2, 16], strides = [1, 1]} : vector<4x16xf32> to vector<2x16xf32>
    %c0_76 = arith.constant 0 : index
    %c0_77 = arith.constant 0 : index
    %c0_78 = arith.constant 0 : index
    %84 = vector.load %arg8[%c0_76, %c0_77, %c0_78] : memref<2x2x16xf32, #tpu.memory_space<vmem>>, vector<1x2x16xf32>
    %85 = vector.shape_cast %84 : vector<1x2x16xf32> to vector<2x16xf32>
    %86 = vector.shape_cast %83 : vector<2x16xf32> to vector<1x2x16xf32>
    tpu.vector_store %arg8[%c0_76, %c0_77, %c0_78], %86 {strides = array<i32>} : memref<2x2x16xf32, #tpu.memory_space<vmem>>, vector<1x2x16xf32>,
    %87 = vector.extract_strided_slice %82 {offsets = [2, 0], sizes = [2, 16], strides = [1, 1]} : vector<4x16xf32> to vector<2x16xf32>
    %c1_79 = arith.constant 1 : index
    %c0_80 = arith.constant 0 : index
    %c0_81 = arith.constant 0 : index
    %88 = vector.load %arg8[%c1_79, %c0_80, %c0_81] : memref<2x2x16xf32, #tpu.memory_space<vmem>>, vector<1x2x16xf32>
    %89 = vector.shape_cast %88 : vector<1x2x16xf32> to vector<2x16xf32>
    %90 = vector.shape_cast %87 : vector<2x16xf32> to vector<1x2x16xf32>
    tpu.vector_store %arg8[%c1_79, %c0_80, %c0_81], %90 {strides = array<i32>} : memref<2x2x16xf32, #tpu.memory_space<vmem>>, vector<1x2x16xf32>,
    return
  }
  func.func @transform_0(%arg0: i32) -> (i32, i32) {
    %c0_i32 = arith.constant 0 : i32
    %c0_i32_0 = arith.constant 0 : i32
    %c0_i32_1 = arith.constant 0 : i32
    return %c0_i32, %c0_i32_0 : i32, i32
  }
  func.func @transform_1(%arg0: i32) -> (i32, i32) {
    %c0_i32 = arith.constant 0 : i32
    %c0_i32_0 = arith.constant 0 : i32
    %c0_i32_1 = arith.constant 0 : i32
    return %c0_i32, %c0_i32_0 : i32, i32
  }
  func.func @transform_2(%arg0: i32) -> (i32, i32) {
    %c0_i32 = arith.constant 0 : i32
    %c0_i32_0 = arith.constant 0 : i32
    %c0_i32_1 = arith.constant 0 : i32
    return %c0_i32, %c0_i32_0 : i32, i32
  }
  func.func @transform_3(%arg0: i32) -> (i32, i32, i32) {
    %c0_i32 = arith.constant 0 : i32
    %c0_i32_0 = arith.constant 0 : i32
    %c0_i32_1 = arith.constant 0 : i32
    %c0_i32_2 = arith.constant 0 : i32
    return %c0_i32, %c0_i32_0, %c0_i32_1 : i32, i32, i32
  }
  func.func @transform_4(%arg0: i32) -> (i32, i32) {
    %c0_i32 = arith.constant 0 : i32
    %c0_i32_0 = arith.constant 0 : i32
    %c0_i32_1 = arith.constant 0 : i32
    return %c0_i32, %c0_i32_0 : i32, i32
  }
  func.func @transform_5(%arg0: i32) -> (i32, i32) {
    %c0_i32 = arith.constant 0 : i32
    %c0_i32_0 = arith.constant 0 : i32
    %c0_i32_1 = arith.constant 0 : i32
    return %c0_i32, %c0_i32_0 : i32, i32
  }
  func.func @transform_6(%arg0: i32) -> (i32, i32) {
    %c0_i32 = arith.constant 0 : i32
    %c0_i32_0 = arith.constant 0 : i32
    %c0_i32_1 = arith.constant 0 : i32
    return %c0_i32, %c0_i32_0 : i32, i32
  }
  func.func @transform_7(%arg0: i32) -> (i32, i32, i32) {
    %c0_i32 = arith.constant 0 : i32
    %c0_i32_0 = arith.constant 0 : i32
    %c0_i32_1 = arith.constant 0 : i32
    %c0_i32_2 = arith.constant 0 : i32
    return %c0_i32, %c0_i32_0, %c0_i32_1 : i32, i32, i32
  }
}

</mosaic_0001>

<bundles_post_ra>
// kernel: siamese_forward.1
= control target key start
LH: loop header
LB: loop body
LE: loop exit
PB: predicated region body
PF: predicated region fallthrough
CT: control target
= control target key end

     0   :  { %vm78_vm0 = vcmask 1043456   ;;  %v1437_v9 = vmov 0   ;;  %vm74_vm1 = vcmask 293888   ;;  %s2541_s0 = inlined_call_operand.vmem [shape: f32[36,1024], index: 0, kind: input, shape index: {}]   ;;  %s2542_s1 = inlined_call_operand.vmem [shape: f32[8,36], index: 1, kind: input, shape index: {}]   ;;  %s2543_s2 = inlined_call_operand.vmem [shape: f32[8,1], index: 2, kind: input, shape index: {}]   ;;  %s2544_s3 = inlined_call_operand.vmem [shape: f32[8,256,32], index: 3, kind: input, shape index: {}]   ;;  %s2545_s4 = inlined_call_operand.vmem [shape: f32[1,32], index: 4, kind: input, shape index: {}]   ;;  %s2546_s5 = inlined_call_operand.vmem [shape: f32[32,16], index: 5, kind: input, shape index: {}]   ;;  %s2547_s6 = inlined_call_operand.vmem [shape: f32[1,16], index: 6, kind: input, shape index: {}]   ;;  %s2548_s7 = inlined_call_operand.hbm [shape: f32[2,2,16], index: 7, kind: output, shape index: {}]  }
   0x1   :  { %v62_v0 = vld [vmem:[%s2541_s0 + $0x110] sm:$0xf]  ;;  %v63_v1 = vld [vmem:[%s2541_s0 + $0x118] sm:$0xf]  ;;  %v61_v4 = vld [vmem:[%s2541_s0 + $0x108] sm:$0xf]  ;;  %1408 = vset.pattern.permute.xlu0 %v1437_v9 }
   0x2   :  { %v54_v2 = vld [vmem:[%s2541_s0 + $0xd0] sm:$0xff]  ;;  %1167 = vmatpush.msk.msra.mxu2 %vm78_vm0, %v62_v0  ;;  %1169 = vmatpush.msk.msra.mxu3 %vm78_vm0, %v63_v1  ;;  %v55_v3 = vld [vmem:[%s2541_s0 + $0xd8] sm:$0xff]  ;;  %v60_v7 = vld [vmem:[%s2541_s0 + $0x100] sm:$0xf] }
   0x3   :  { %v46_v5 = vld [vmem:[%s2541_s0 + $0x90] sm:$0xff]  ;;  %1165 = vmatpush.msk.msra.mxu1 %vm78_vm0, %v61_v4  ;;  %v47_v6 = vld [vmem:[%s2541_s0 + $0x98] sm:$0xff]  ;;  %v53_v8 = vld [vmem:[%s2541_s0 + $0xc8] sm:$0xff]  ;;  %1163 = vmatpush.msk.msra.mxu0 %vm78_vm0, %v60_v7 }
   0x4   :  { %155 = vmatpush.msra.mxu2 %v54_v2  ;;  %175 = vmatpush.msra.mxu3 %v55_v3  ;;  %v52_v10 = vld [vmem:[%s2541_s0 + $0xc0] sm:$0xff]  ;;  %v38_v11 = vld [vmem:[%s2541_s0 + $0x50] sm:$0xff]  ;;  %v39_v12 = vld [vmem:[%s2541_s0 + $0x58] sm:$0xff] }
   0x5   :  { %135 = vmatpush.msra.mxu1 %v53_v8  ;;  %v45_v13 = vld [vmem:[%s2541_s0 + $0x88] sm:$0xff]  ;;  %v44_v14 = vld [vmem:[%s2541_s0 + $0x80] sm:$0xff]  ;;  %115 = vmatpush.msra.mxu0 %v52_v10  ;;  %v30_v15 = vld [vmem:[%s2541_s0 + $0x10] sm:$0xff] }
   0x6   :  { %156 = vmatpush.msra.mxu2 %v46_v5  ;;  %176 = vmatpush.msra.mxu3 %v47_v6  ;;  %v31_v16 = vld [vmem:[%s2541_s0 + $0x18] sm:$0xff]  ;;  %v37_v17 = vld [vmem:[%s2541_s0 + $0x48] sm:$0xff]  ;;  %v66_v18 = vld [vmem:[%s2541_s0 + $0x130] sm:$0xf] }
   0x7   :  { %136 = vmatpush.msra.mxu1 %v45_v13  ;;  %v67_v19 = vld [vmem:[%s2541_s0 + $0x138] sm:$0xf]  ;;  %116 = vmatpush.msra.mxu0 %v44_v14  ;;  %v1545_v20 = vld [vmem:[%s2542_s1] sm:$0xff]  ;;  %v58_v21 = vld [vmem:[%s2541_s0 + $0xf0] sm:$0xff] }
   0x8   :  { %157 = vmatpush.msra.mxu2 %v38_v11  ;;  %177 = vmatpush.msra.mxu3 %v39_v12  ;;  %v59_v22 = vld [vmem:[%s2541_s0 + $0xf8] sm:$0xff]  ;;  %v36_v23 = vld [vmem:[%s2541_s0 + $0x40] sm:$0xff]  ;;  %v29_v24 = vld [vmem:[%s2541_s0 + $0x8] sm:$0xff] }
   0x9   :  { %137 = vmatpush.msra.mxu1 %v37_v17  ;;  %v65_v25 = vld [vmem:[%s2541_s0 + $0x128] sm:$0xf]  ;;  %v50_v26 = vld [vmem:[%s2541_s0 + $0xb0] sm:$0xff]  ;;  %v51_v27 = vld [vmem:[%s2541_s0 + $0xb8] sm:$0xff]  ;;  %117 = vmatpush.msra.mxu0 %v36_v23 }
   0xa   :  { %158 = vmatpush.msra.mxu2 %v30_v15  ;;  %178 = vmatpush.msra.mxu3 %v31_v16  ;;  %v28_v28 = vld [vmem:[%s2541_s0] sm:$0xff]  ;;  %v57_v30 = vld [vmem:[%s2541_s0 + $0xe8] sm:$0xff]  ;;  %v42_v31 = vld [vmem:[%s2541_s0 + $0x70] sm:$0xff] }
   0xb   :  { %1168 = vmatmul.msk.f32.vlgmr.msra.gmra.mxu2 %vm74_vm1, %v1545_v20  ;;  %1170 = vmatmul.msk.f32.vlgmr.msra.gmra.mxu3 %vm74_vm1, %v1545_v20  ;;  %v64_v29 = vld [vmem:[%s2541_s0 + $0x120] sm:$0xf]  ;;  %v43_v32 = vld [vmem:[%s2541_s0 + $0x78] sm:$0xff]  ;;  %v49_v34 = vld [vmem:[%s2541_s0 + $0xa8] sm:$0xff] }
   0xc   :  { %1175 = vmatpush.msk.msrb.mxu2 %vm78_vm0, %v66_v18  ;;  %1177 = vmatpush.msk.msrb.mxu3 %vm78_vm0, %v67_v19  ;;  %v56_v33 = vld [vmem:[%s2541_s0 + $0xe0] sm:$0xff]  ;;  %v34_v35 = vld [vmem:[%s2541_s0 + $0x30] sm:$0xff]  ;;  %v35_v36 = vld [vmem:[%s2541_s0 + $0x38] sm:$0xff] }
   0xd   :  { %138 = vmatpush.msra.mxu1 %v29_v24  ;;  %118 = vmatpush.msra.mxu0 %v28_v28  ;;  %v48_v37 = vld [vmem:[%s2541_s0 + $0xa0] sm:$0xff]  ;;  %v41_v38 = vld [vmem:[%s2541_s0 + $0x68] sm:$0xff]  ;;  %v466_v40 = vld [vmem:[%s2544_s3 + $0x78] sm:$0xff] }
   0xe   :  { %235 = vmatpush.msrb.mxu2 %v58_v21  ;;  %255 = vmatpush.msrb.mxu3 %v59_v22  ;;  %v68_v39 = vld [vmem:[%s2543_s2] sm:$0xff]  ;;  %v33_v42 = vld [vmem:[%s2541_s0 + $0x28] sm:$0xff]  ;;  %v482_v43 = vld [vmem:[%s2544_s3 + $0xf8] sm:$0xff] }
   0xf   :  { %1173 = vmatpush.msk.msrb.mxu1 %vm78_vm0, %v65_v25  ;;  %1171 = vmatpush.msk.msrb.mxu0 %vm78_vm0, %v64_v29  ;;  %v40_v41 = vld [vmem:[%s2541_s0 + $0x60] sm:$0xff]  ;;  %v1210_v45 = vld [vmem:[%s2544_s3 + $0x1f8] sm:$0xff]  ;;  %v465_v46 = vld [vmem:[%s2544_s3 + $0x70] sm:$0xff] }
  0x10   :  { %236 = vmatpush.msrb.mxu2 %v50_v26  ;;  %256 = vmatpush.msrb.mxu3 %v51_v27  ;;  %v32_v44 = vld [vmem:[%s2541_s0 + $0x20] sm:$0xff]  ;;  %v1194_v47 = vld [vmem:[%s2544_s3 + $0x178] sm:$0xff]  ;;  %v1209_v48 = vld [vmem:[%s2544_s3 + $0x1f0] sm:$0xff] }
  0x11   :  { %1166 = vmatmul.msk.f32.vlgmr.msra.gmra.mxu1 %vm74_vm1, %v1545_v20  ;;  %1164 = vmatmul.msk.f32.vlgmr.msra.gmra.mxu0 %vm74_vm1, %v1545_v20  ;;  %v481_v49 = vld [vmem:[%s2544_s3 + $0xf0] sm:$0xff]  ;;  %v464_v50 = vld [vmem:[%s2544_s3 + $0x68] sm:$0xff]  ;;  %v463_v55 = vld [vmem:[%s2544_s3 + $0x60] sm:$0xff] }
  0x12   :  { %215 = vmatpush.msrb.mxu1 %v57_v30  ;;  %237 = vmatpush.msrb.mxu2 %v42_v31  ;;  %v1193_v51 = vld [vmem:[%s2544_s3 + $0x170] sm:$0xff]  ;;  %v1192_v52 = vld [vmem:[%s2544_s3 + $0x168] sm:$0xff]  ;;  %v1207_v56 = vld [vmem:[%s2544_s3 + $0x1e0] sm:$0xff] }
  0x13   :  { %257 = vmatpush.msrb.mxu3 %v43_v32  ;;  %195 = vmatpush.msrb.mxu0 %v56_v33  ;;  %v1208_v53 = vld [vmem:[%s2544_s3 + $0x1e8] sm:$0xff] }
  0x14   :  { %216 = vmatpush.msrb.mxu1 %v49_v34  ;;  %238 = vmatpush.msrb.mxu2 %v34_v35  ;;  %v480_v54 = vld [vmem:[%s2544_s3 + $0xe8] sm:$0xff] }
  0x15   :  { %258 = vmatpush.msrb.mxu3 %v35_v36  ;;  %1176 = vmatmul.msk.f32.vlgmr.msrb.gmra.mxu2 %vm74_vm1, %v1545_v20 }
  0x16   :  { %1178 = vmatmul.msk.f32.vlgmr.msrb.gmra.mxu3 %vm74_vm1, %v1545_v20  ;;  %196 = vmatpush.msrb.mxu0 %v48_v37 }
  0x17   :  { %217 = vmatpush.msrb.mxu1 %v41_v38  ;;  %71 = vperm.xlu0 %1408, %v68_v39  }
  0x18   :  { %570 = vmatpush.msra.mxu2 %v466_v40  ;;  %197 = vmatpush.msrb.mxu0 %v40_v41 }
  0x19   :  { %218 = vmatpush.msrb.mxu1 %v33_v42  ;;  %590 = vmatpush.msra.mxu3 %v482_v43 }
  0x1a   :  { %1174 = vmatmul.msk.f32.vlgmr.msrb.gmra.mxu1 %vm74_vm1, %v1545_v20  ;;  %198 = vmatpush.msrb.mxu0 %v32_v44 }
  0x1b   :  { %544 = vmatpush.msra.mxu1 %v1210_v45  ;;  %1172 = vmatmul.msk.f32.vlgmr.msrb.gmra.mxu0 %vm74_vm1, %v1545_v20 }
  0x1c   :  { %571 = vmatpush.msra.mxu2 %v465_v46  ;;  %524 = vmatpush.msra.mxu0 %v1194_v47 }
  0x1d   :  { %545 = vmatpush.msra.mxu1 %v1209_v48  ;;  %591 = vmatpush.msra.mxu3 %v481_v49 }
  0x1e   :  { %572 = vmatpush.msra.mxu2 %v464_v50 }
  0x1f   :  { %12 = vsyncpa [#allocation4], 0  ;;  %525 = vmatpush.msra.mxu0 %v1193_v51  ;;  %546 = vmatpush.msra.mxu1 %v1208_v53  ;;  %v479_v57 = vld [vmem:[%s2544_s3 + $0xe0] sm:$0xff]  ;;  %v462_v58 = vld [vmem:[%s2544_s3 + $0x58] sm:$0xff]  ;;  %vm274_vm2 = vcmask 1040384   ;;  %vm276_vm3 = vcmask 1041409  }
  0x20   :  { %v1191_v59 = vld [vmem:[%s2544_s3 + $0x160] sm:$0xff]  ;;  %v1206_v60 = vld [vmem:[%s2544_s3 + $0x1d8] sm:$0xff]  ;;  %592 = vmatpush.msra.mxu3 %v480_v54  ;;  %573 = vmatpush.msra.mxu2 %v463_v55  ;;  %v461_v62 = vld [vmem:[%s2544_s3 + $0x50] sm:$0xff]  ;;  %vm279_vm4 = vcmask 1042434   ;;  %vm282_vm5 = vcmask 1043459   ;;  %vm285_vm6 = vcmask 1044484  }
  0x21   :  { %526 = vmatpush.msra.mxu0 %v1192_v52  ;;  %547 = vmatpush.msra.mxu1 %v1207_v56  ;;  %v478_v61 = vld [vmem:[%s2544_s3 + $0xd8] sm:$0xff]  ;;  %v1205_v0 = vld [vmem:[%s2544_s3 + $0x1d0] sm:$0xff]  ;;  %v460_v2 = vld [vmem:[%s2544_s3 + $0x48] sm:$0xff]  ;;  %vm288_vm7 = vcmask 1045509   ;;  %vm291_vm8 = vcmask 1046534   ;;  %vm294_vm10 = vcmask 1046528  }
  0x22   :  { %v1190_v63 = vld [vmem:[%s2544_s3 + $0x158] sm:$0xff]  ;;  %593 = vmatpush.msra.mxu3 %v479_v57  ;;  %574 = vmatpush.msra.mxu2 %v462_v58  ;;  %v477_v1 = vld [vmem:[%s2544_s3 + $0xd0] sm:$0xff]  ;;  %v1204_v4 = vld [vmem:[%s2544_s3 + $0x1c8] sm:$0xff]  ;;  %v305_v57 = vlaneseq  ;;  %vm1116_vm11 = vcmask 261120   ;;  %s1438_s15 = smov [#allocation3]   ;;  %s1151_s19 = sshll.u32 %s2548_s7, 4  ;;  %s1152_s19 = int_to_ptr.hbm [resolvable:$true] %s1151_s19 }
  0x23   :  { %527 = vmatpush.msra.mxu0 %v1191_v59  ;;  %548 = vmatpush.msra.mxu1 %v1206_v60  ;;  %v1189_v3 = vld [vmem:[%s2544_s3 + $0x150] sm:$0xff]  ;;  %v476_v5 = vld [vmem:[%s2544_s3 + $0xc8] sm:$0xff]  ;;  %v459_v6 = vld [vmem:[%s2544_s3 + $0x40] sm:$0xff]  ;;  %s1149_s16 = sshll.u32 %s1438_s15, 4  ;;  %vm1140_vm12 = vcmask 123904   ;;  %vm1143_vm13 = vcmask 125954   ;;  %s1150_s16 = int_to_ptr.vmem [resolvable:$true] %s1149_s16 }
  0x24   :  { %594 = vmatpush.msra.mxu3 %v478_v61  ;;  %575 = vmatpush.msra.mxu2 %v461_v62  ;;  %v1188_v7 = vld [vmem:[%s2544_s3 + $0x148] sm:$0xff]  ;;  %v1203_v8 = vld [vmem:[%s2544_s3 + $0x1c0] sm:$0xff]  ;;  %v458_v10 = vld [vmem:[%s2544_s3 + $0x38] sm:$0xff]  ;;  %vm1888_vm9 = vcmp.lt.s32.totalorder %v305_v57, 256  ;;  %s1440_s20 = smov 2  }
  0x25   :  { %528 = vmatpush.msra.mxu0 %v1190_v63  ;;  %549 = vmatpush.msra.mxu1 %v1205_v0  ;;  %v475_v9 = vld [vmem:[%s2544_s3 + $0xc0] sm:$0xff]  ;;  %v1202_v12 = vld [vmem:[%s2544_s3 + $0x1b8] sm:$0xff]  ;;  %v1201_v15 = vld [vmem:[%s2544_s3 + $0x1b0] sm:$0xff] }
  0x26   :  { %595 = vmatpush.msra.mxu3 %v477_v1  ;;  %576 = vmatpush.msra.mxu2 %v460_v2  ;;  %v1187_v11 = vld [vmem:[%s2544_s3 + $0x140] sm:$0xff]  ;;  %v474_v13 = vld [vmem:[%s2544_s3 + $0xb8] sm:$0xff]  ;;  %v1185_v16 = vld [vmem:[%s2544_s3 + $0x130] sm:$0xff] }
  0x27   :  { %529 = vmatpush.msra.mxu0 %v1189_v3  ;;  %550 = vmatpush.msra.mxu1 %v1204_v4  ;;  %v1186_v14 = vld [vmem:[%s2544_s3 + $0x138] sm:$0xff]  ;;  %v1200_v17 = vld [vmem:[%s2544_s3 + $0x1a8] sm:$0xff]  ;;  %v1199_v19 = vld [vmem:[%s2544_s3 + $0x1a0] sm:$0xff] }
  0x28   :  { %596 = vmatpush.msra.mxu3 %v476_v5  ;;  %577 = vmatpush.msra.mxu2 %v459_v6  ;;  %v1184_v18 = vld [vmem:[%s2544_s3 + $0x128] sm:$0xff]  ;;  %v1183_v20 = vld [vmem:[%s2544_s3 + $0x120] sm:$0xff]  ;;  %v1198_v21 = vld [vmem:[%s2544_s3 + $0x198] sm:$0xff] }
  0x29   :  { %530 = vmatpush.msra.mxu0 %v1188_v7  ;;  %551 = vmatpush.msra.mxu1 %v1203_v8  ;;  %v1182_v22 = vld [vmem:[%s2544_s3 + $0x118] sm:$0xff]  ;;  %v1181_v23 = vld [vmem:[%s2544_s3 + $0x110] sm:$0xff]  ;;  %v1180_v27 = vld [vmem:[%s2544_s3 + $0x108] sm:$0xff] }
  0x2a   :  { %597 = vmatpush.msra.mxu3 %v475_v9  ;;  %578 = vmatpush.msra.mxu2 %v458_v10  ;;  %v1197_v24 = vld [vmem:[%s2544_s3 + $0x190] sm:$0xff]  ;;  %v1196_v28 = vld [vmem:[%s2544_s3 + $0x188] sm:$0xff]  ;;  %v1179_v31 = vld [vmem:[%s2544_s3 + $0x100] sm:$0xff] }
  0x2b   :  { %531 = vmatpush.msra.mxu0 %v1187_v11  ;;  %552 = vmatpush.msra.mxu1 %v1202_v12  ;;  %v457_v25 = vld [vmem:[%s2544_s3 + $0x30] sm:$0xff]  ;;  %v456_v29 = vld [vmem:[%s2544_s3 + $0x28] sm:$0xff]  ;;  %v1195_v32 = vld [vmem:[%s2544_s3 + $0x180] sm:$0xff] }
  0x2c   :  { %598 = vmatpush.msra.mxu3 %v474_v13  ;;  %v473_v26 = vld [vmem:[%s2544_s3 + $0xb0] sm:$0xff]  ;;  %579 = vmatpush.msra.mxu2 %v457_v25  ;;  %v472_v30 = vld [vmem:[%s2544_s3 + $0xa8] sm:$0xff]  ;;  %v455_v33 = vld [vmem:[%s2544_s3 + $0x20] sm:$0xff] }
  0x2d   :  { %532 = vmatpush.msra.mxu0 %v1186_v14  ;;  %553 = vmatpush.msra.mxu1 %v1201_v15  ;;  %v471_v34 = vld [vmem:[%s2544_s3 + $0xa0] sm:$0xff]  ;;  %v1226_v35 = vld [vmem:[%s2544_s3 + $0x278] sm:$0xff]  ;;  %v1225_v39 = vld [vmem:[%s2544_s3 + $0x270] sm:$0xff] }
  0x2e   :  { %599 = vmatpush.msra.mxu3 %v473_v26  ;;  %580 = vmatpush.msra.mxu2 %v456_v29  ;;  %v1242_v36 = vld [vmem:[%s2544_s3 + $0x2f8] sm:$0xff]  ;;  %v1241_v40 = vld [vmem:[%s2544_s3 + $0x2f0] sm:$0xff]  ;;  %v1224_v43 = vld [vmem:[%s2544_s3 + $0x268] sm:$0xff] }
  0x2f   :  { %533 = vmatpush.msra.mxu0 %v1185_v16  ;;  %554 = vmatpush.msra.mxu1 %v1200_v17  ;;  %v454_v37 = vld [vmem:[%s2544_s3 + $0x18] sm:$0xff]  ;;  %v453_v41 = vld [vmem:[%s2544_s3 + $0x10] sm:$0xff]  ;;  %v1240_v44 = vld [vmem:[%s2544_s3 + $0x2e8] sm:$0xff] }
  0x30   :  { %600 = vmatpush.msra.mxu3 %v472_v30  ;;  %581 = vmatpush.msra.mxu2 %v455_v33  ;;  %v470_v38 = vld [vmem:[%s2544_s3 + $0x98] sm:$0xff]  ;;  %v469_v42 = vld [vmem:[%s2544_s3 + $0x90] sm:$0xff]  ;;  %v452_v45 = vld [vmem:[%s2544_s3 + $0x8] sm:$0xff] }
  0x31   :  { %534 = vmatpush.msra.mxu0 %v1184_v18  ;;  %555 = vmatpush.msra.mxu1 %v1199_v19  ;;  %v468_v46 = vld [vmem:[%s2544_s3 + $0x88] sm:$0xff]  ;;  %v1223_v48 = vld [vmem:[%s2544_s3 + $0x260] sm:$0xff]  ;;  %v1222_v53 = vld [vmem:[%s2544_s3 + $0x258] sm:$0xff] }
  0x32   :  { %601 = vmatpush.msra.mxu3 %v471_v34  ;;  %582 = vmatpush.msra.mxu2 %v454_v37  ;;  %v1239_v49 = vld [vmem:[%s2544_s3 + $0x2e0] sm:$0xff]  ;;  %v1238_v54 = vld [vmem:[%s2544_s3 + $0x2d8] sm:$0xff]  ;;  %v1221_v0 = vld [vmem:[%s2544_s3 + $0x250] sm:$0xff] }
  0x33   :  { %535 = vmatpush.msra.mxu0 %v1183_v20  ;;  %556 = vmatpush.msra.mxu1 %v1198_v21  ;;  %v451_v50 = vld [vmem:[%s2544_s3] sm:$0xff]  ;;  %v1258_v55 = vld [vmem:[%s2544_s3 + $0x378] sm:$0xff]  ;;  %v1237_v1 = vld [vmem:[%s2544_s3 + $0x2d0] sm:$0xff] }
  0x34   :  { %602 = vmatpush.msra.mxu3 %v470_v38  ;;  %583 = vmatpush.msra.mxu2 %v453_v41  ;;  %v467_v51 = vld [vmem:[%s2544_s3 + $0x80] sm:$0xff]  ;;  %v1274_v60 = vld [vmem:[%s2544_s3 + $0x3f8] sm:$0xff]  ;;  %v1257_v2 = vld [vmem:[%s2544_s3 + $0x370] sm:$0xff] }
  0x35   :  { %536 = vmatpush.msra.mxu0 %v1182_v22  ;;  %557 = vmatpush.msra.mxu1 %v1197_v24  ;;  %v1273_v5 = vld [vmem:[%s2544_s3 + $0x3f0] sm:$0xff]  ;;  %v1220_v7 = vld [vmem:[%s2544_s3 + $0x248] sm:$0xff]  ;;  %v1219_v16 = vld [vmem:[%s2544_s3 + $0x240] sm:$0xff] }
  0x36   :  { %603 = vmatpush.msra.mxu3 %v469_v42  ;;  %584 = vmatpush.msra.mxu2 %v452_v45  ;;  %v1236_v8 = vld [vmem:[%s2544_s3 + $0x2c8] sm:$0xff]  ;;  %v1235_v17 = vld [vmem:[%s2544_s3 + $0x2c0] sm:$0xff]  ;;  %v1234_v33 = vld [vmem:[%s2544_s3 + $0x2b8] sm:$0xff] }
  0x37   :  { %537 = vmatpush.msra.mxu0 %v1181_v23  ;;  %558 = vmatpush.msra.mxu1 %v1196_v28  ;;  %v1256_v9 = vld [vmem:[%s2544_s3 + $0x368] sm:$0xff]  ;;  %v1255_v18 = vld [vmem:[%s2544_s3 + $0x360] sm:$0xff]  ;;  %v1254_v34 = vld [vmem:[%s2544_s3 + $0x358] sm:$0xff] }
  0x38   :  { %604 = vmatpush.msra.mxu3 %v468_v46  ;;  %585 = vmatpush.msra.mxu2 %v451_v50  ;;  %v1272_v13 = vld [vmem:[%s2544_s3 + $0x3e8] sm:$0xff]  ;;  %v1271_v23 = vld [vmem:[%s2544_s3 + $0x3e0] sm:$0xff]  ;;  %v1233_v45 = vld [vmem:[%s2544_s3 + $0x2b0] sm:$0xff] }
  0x39   :  { %538 = vmatpush.msra.mxu0 %v1180_v27  ;;  %559 = vmatpush.msra.mxu1 %v1195_v32  ;;  %v1218_v32 = vld [vmem:[%s2544_s3 + $0x238] sm:$0xff]  ;;  %v1289_v12 = vld [vmem:[%s2544_s3 + $0x470] sm:$0xff] }
  0x3a   :  { %605 = vmatpush.msra.mxu3 %v467_v51  ;;  %733 = vmatpush.msrb.mxu2 %v1258_v55 }
  0x3b   :  { %539 = vmatpush.msra.mxu0 %v1179_v31  ;;  %671 = vmatpush.msrb.mxu1 %v1242_v36 }
  0x3c   :  { %753 = vmatpush.msrb.mxu3 %v1274_v60  ;;  %734 = vmatpush.msrb.mxu2 %v1257_v2 }
  0x3d   :  { %651 = vmatpush.msrb.mxu0 %v1226_v35  ;;  %672 = vmatpush.msrb.mxu1 %v1241_v40 }
  0x3e   :  { %754 = vmatpush.msrb.mxu3 %v1273_v5  ;;  %735 = vmatpush.msrb.mxu2 %v1256_v9 }
  0x3f   :  { %652 = vmatpush.msrb.mxu0 %v1225_v39  ;;  %673 = vmatpush.msrb.mxu1 %v1240_v44  ;;  %v1217_v44 = vld [vmem:[%s2544_s3 + $0x230] sm:$0xff] }
  0x40   :  { %755 = vmatpush.msrb.mxu3 %v1272_v13  ;;  %736 = vmatpush.msrb.mxu2 %v1255_v18 }
  0x41   :  { %653 = vmatpush.msrb.mxu0 %v1224_v43  ;;  %674 = vmatpush.msrb.mxu1 %v1239_v49  ;;  %v1270_v43 = vld [vmem:[%s2544_s3 + $0x3d8] sm:$0xff] }
  0x42   :  { %756 = vmatpush.msrb.mxu3 %v1271_v23  ;;  %737 = vmatpush.msrb.mxu2 %v1254_v34  ;;  %v1265_v34 = vld [vmem:[%s2544_s3 + $0x3b0] sm:$0xff] }
  0x43   :  { %654 = vmatpush.msrb.mxu0 %v1223_v48  ;;  %675 = vmatpush.msrb.mxu1 %v1238_v54 }
  0x44   :  { %757 = vmatpush.msrb.mxu3 %v1270_v43  ;;  %v1248_v43 = vld [vmem:[%s2544_s3 + $0x328] sm:$0xff] }
  0x45   :  { %655 = vmatpush.msrb.mxu0 %v1222_v53  ;;  %676 = vmatpush.msrb.mxu1 %v1237_v1  ;;  %v1252_v1 = vld [vmem:[%s2544_s3 + $0x348] sm:$0xff] }
  0x47   :  { %656 = vmatpush.msrb.mxu0 %v1221_v0  ;;  %677 = vmatpush.msrb.mxu1 %v1236_v8  ;;  %v1232_v0 = vld [vmem:[%s2544_s3 + $0x2a8] sm:$0xff] }
  0x49   :  { %657 = vmatpush.msrb.mxu0 %v1220_v7  ;;  %678 = vmatpush.msrb.mxu1 %v1235_v17  ;;  %v1215_v7 = vld [vmem:[%s2544_s3 + $0x220] sm:$0xff] }
  0x4b   :  { %658 = vmatpush.msrb.mxu0 %v1219_v16  ;;  %679 = vmatpush.msrb.mxu1 %v1234_v33  ;;  %v1249_v33 = vld [vmem:[%s2544_s3 + $0x330] sm:$0xff] }
  0x4d   :  { %659 = vmatpush.msrb.mxu0 %v1218_v32  ;;  %680 = vmatpush.msrb.mxu1 %v1233_v45  ;;  %v1264_v45 = vld [vmem:[%s2544_s3 + $0x3a8] sm:$0xff] }
  0x4f   :  { %660 = vmatpush.msrb.mxu0 %v1217_v44  ;;  %681 = vmatpush.msrb.mxu1 %v1232_v0 }
  0x89   :  { %v1837_v47 = vpop.permute.xlu0 %71 }
  0x8e   :  { %v140_v52 = vpop.f32.mrf.mxu1  ;;  %v160_v58 = vpop.f32.mrf.mxu2 }
  0x8f   :  { %v141_v56 = vadd.f32 %v140_v52, %v1837_v47  ;;  %v180_v59 = vpop.f32.mrf.mxu3  ;;  %v120_v61 = vpop.f32.mrf.mxu0  ;;  %v161_v62 = vadd.f32 %v160_v58, %v1837_v47 }
  0x90   :  { %v181_v63 = vadd.f32 %v180_v59, %v1837_v47  ;;  %v121_v4 = vadd.f32 %v120_v61, %v1837_v47  ;;  %v1269_v61 = vld [vmem:[%s2544_s3 + $0x3d0] sm:$0xff] }
  0x91   :  { %v264_v3 = vmax.f32 %v141_v56, 0.0  ;;  %v265_v14 = vmax.f32 %v161_v62, 0.0  ;;  %v1253_v56 = vld [vmem:[%s2544_s3 + $0x350] sm:$0xff]  ;;  %758 = vmatpush.msrb.mxu3 %v1269_v61 }
  0x92   :  { %v266_v6 = vmax.f32 %v181_v63, 0.0  ;;  %v263_v11 = vmax.f32 %v121_v4, 0.0  ;;  %738 = vmatpush.msrb.mxu2 %v1253_v56  ;;  %v1216_v63 = vld [vmem:[%s2544_s3 + $0x228] sm:$0xff]  ;;  %v1262_v56 = vld [vmem:[%s2544_s3 + $0x398] sm:$0xff] }
  0x93   :  { %v273_v10 = vrot.slane %v264_v3, 7  ;;  %661 = vmatpush.msrb.mxu0 %v1216_v63  ;;  %v1268_v4 = vld [vmem:[%s2544_s3 + $0x3c8] sm:$0xff] }
  0x94   :  { %v326_v15 = vrot.slane %v266_v6, 7  ;;  %739 = vmatpush.msrb.mxu2 %v1252_v1  ;;  %759 = vmatpush.msrb.mxu3 %v1268_v4  ;;  %v1244_v1 = vld [vmem:[%s2544_s3 + $0x308] sm:$0xff] }
  0x95   :  { %v275_v19 = vsel %vm274_vm2, %v263_v11, %v273_v10  ;;  %v277_v20 = vsel %vm276_vm3, %v263_v11, %v273_v10  ;;  %v280_v21 = vsel %vm279_vm4, %v263_v11, %v273_v10  ;;  %v283_v22 = vsel %vm282_vm5, %v263_v11, %v273_v10  ;;  %662 = vmatpush.msrb.mxu0 %v1215_v7  ;;  %v1259_v7 = vld [vmem:[%s2544_s3 + $0x380] sm:$0xff] }
  0x96   :  { %v278_v24 = vrot.slane %v277_v20, 1  ;;  %v281_v25 = vrot.slane %v280_v21, 2  ;;  %v284_v26 = vrot.slane %v283_v22, 3  ;;  %v286_v27 = vsel %vm285_vm6, %v263_v11, %v273_v10  ;;  %309 = vst.msk [vmem:[#allocation2] ss:$4 sm:$0x3] %vm1888_vm9, %v275_v19 }
  0x97   :  { %v287_v28 = vrot.slane %v286_v27, 4  ;;  %v289_v29 = vsel %vm288_vm7, %v263_v11, %v273_v10  ;;  %v292_v30 = vsel %vm291_vm8, %v263_v11, %v273_v10  ;;  %v295_v31 = vsel %vm294_vm10, %v273_v10, %v263_v11  ;;  %v220_v41 = vpop.f32.mrf.mxu1  ;;  %v1231_v10 = vld [vmem:[%s2544_s3 + $0x2a0] sm:$0xff]  ;;  %v1230_v19 = vld [vmem:[%s2544_s3 + $0x298] sm:$0xff]  ;;  %v1229_v27 = vld [vmem:[%s2544_s3 + $0x290] sm:$0xff] }
  0x98   :  { %v290_v35 = vrot.slane %v289_v29, 5  ;;  %v293_v36 = vrot.slane %v292_v30, 6  ;;  %311 = vst.msk [vmem:[#allocation2 + $0x8] ss:$4 sm:$0x3] %vm1888_vm9, %v278_v24  ;;  %v328_v37 = vsel %vm276_vm3, %v265_v14, %v326_v15  ;;  %v330_v38 = vsel %vm279_vm4, %v265_v14, %v326_v15  ;;  %v200_v42 = vpop.f32.mrf.mxu0  ;;  %v240_v9 = vpop.f32.mrf.mxu2  ;;  %v1251_v11 = vld [vmem:[%s2544_s3 + $0x340] sm:$0xff]  ;;  %682 = vmatpush.msrb.mxu1 %v1231_v10 }
  0x99   :  { %313 = vst.msk [vmem:[#allocation2 + $0x10] ss:$4 sm:$0x3] %vm1888_vm9, %v281_v25  ;;  %v332_v39 = vsel %vm282_vm5, %v265_v14, %v326_v15  ;;  %v1934_v40 = vsel %vm285_vm6, %v265_v14, %v326_v15  ;;  %v296_v46 = vrot.slane %v295_v31, 7  ;;  %v329_v48 = vrot.slane %v328_v37, 1  ;;  %v260_v51 = vpop.f32.mrf.mxu3  ;;  %740 = vmatpush.msrb.mxu2 %v1251_v11  ;;  %v1250_v20 = vld [vmem:[%s2544_s3 + $0x338] sm:$0xff] }
  0x9a   :  { %315 = vst.msk [vmem:[#allocation2 + $0x18] ss:$4 sm:$0x3] %vm1888_vm9, %v284_v26  ;;  %v331_v49 = vrot.slane %v330_v38, 2  ;;  %v336_v50 = vsel %vm288_vm7, %v265_v14, %v326_v15  ;;  %v327_v52 = vsel %vm274_vm2, %v265_v14, %v326_v15  ;;  %v333_v53 = vrot.slane %v332_v39, 3  ;;  %v1266_v21 = vld [vmem:[%s2544_s3 + $0x3b8] sm:$0xff]  ;;  %683 = vmatpush.msrb.mxu1 %v1230_v19 }
  0x9b   :  { %317 = vst.msk [vmem:[#allocation2 + $0x20] ss:$4 sm:$0x3] %vm1888_vm9, %v287_v28  ;;  %v335_v54 = vrot.slane %v1934_v40, 4  ;;  %v338_v55 = vsel %vm291_vm8, %v265_v14, %v326_v15  ;;  %v337_v57 = vrot.slane %v336_v50, 5  ;;  %v340_v58 = vsel %vm294_vm10, %v326_v15, %v265_v14  ;;  %v1267_v14 = vld [vmem:[%s2544_s3 + $0x3c0] sm:$0xff]  ;;  %741 = vmatpush.msrb.mxu2 %v1250_v20 }
  0x9c   :  { %319 = vst.msk [vmem:[#allocation2 + $0x28] ss:$4 sm:$0x3] %vm1888_vm9, %v290_v35  ;;  %v221_v59 = vadd.f32 %v220_v41, %v1837_v47  ;;  %v201_v60 = vadd.f32 %v200_v42, %v1837_v47  ;;  %v261_v62 = vadd.f32 %v260_v51, %v1837_v47  ;;  %v339_v5 = vrot.slane %v338_v55, 6  ;;  %v1214_v15 = vld [vmem:[%s2544_s3 + $0x218] sm:$0xff]  ;;  %760 = vmatpush.msrb.mxu3 %v1267_v14  ;;  %v1213_v26 = vld [vmem:[%s2544_s3 + $0x210] sm:$0xff] }
  0x9d   :  { %321 = vst.msk [vmem:[#allocation2 + $0x30] ss:$4 sm:$0x3] %vm1888_vm9, %v293_v36  ;;  %v341_v6 = vrot.slane %v340_v58, 7  ;;  %v241_v22 = vadd.f32 %v240_v9, %v1837_v47  ;;  %663 = vmatpush.msrb.mxu0 %v1214_v15  ;;  %v1212_v35 = vld [vmem:[%s2544_s3 + $0x208] sm:$0xff]  ;;  %684 = vmatpush.msrb.mxu1 %v1229_v27  ;;  %v1247_v50 = vld [vmem:[%s2544_s3 + $0x320] sm:$0xff] }
  0x9e   :  { %323 = vst.msk [vmem:[#allocation2 + $0x38] ss:$4 sm:$0x3] %vm1888_vm9, %v296_v46  ;;  %v268_v2 = vmax.f32 %v221_v59, 0.0  ;;  %v267_v3 = vmax.f32 %v201_v60, 0.0  ;;  %v270_v13 = vmax.f32 %v261_v62, 0.0  ;;  %761 = vmatpush.msrb.mxu3 %v1266_v21  ;;  %742 = vmatpush.msrb.mxu2 %v1249_v33 }
  0x9f   :  { %351 = vst.msk [vmem:[#allocation2 + $0x1] ss:$4 sm:$0x3] %vm1888_vm9, %v327_v52  ;;  %v269_v37 = vmax.f32 %v241_v22, 0.0  ;;  %664 = vmatpush.msrb.mxu0 %v1213_v26  ;;  %v1228_v39 = vld [vmem:[%s2544_s3 + $0x288] sm:$0xff]  ;;  %v1211_v46 = vld [vmem:[%s2544_s3 + $0x200] sm:$0xff] }
  0xa0   :  { %353 = vst.msk [vmem:[#allocation2 + $0x9] ss:$4 sm:$0x3] %vm1888_vm9, %v329_v48  ;;  %v368_v8 = vrot.slane %v268_v2, 7  ;;  %v410_v30 = vrot.slane %v270_v13, 7  ;;  %762 = vmatpush.msrb.mxu3 %v1265_v34  ;;  %685 = vmatpush.msrb.mxu1 %v1228_v39  ;;  %v1227_v48 = vld [vmem:[%s2544_s3 + $0x280] sm:$0xff] }
  0xa1   :  { %355 = vst.msk [vmem:[#allocation2 + $0x11] ss:$4 sm:$0x3] %vm1888_vm9, %v331_v49  ;;  %665 = vmatpush.msrb.mxu0 %v1212_v35  ;;  %743 = vmatpush.msrb.mxu2 %v1248_v43  ;;  %v1263_v51 = vld [vmem:[%s2544_s3 + $0x3a0] sm:$0xff]  ;;  %v1246_v55 = vld [vmem:[%s2544_s3 + $0x318] sm:$0xff]  ;;  %v1245_v59 = vld [vmem:[%s2544_s3 + $0x310] sm:$0xff] }
  0xa2   :  { %357 = vst.msk [vmem:[#allocation2 + $0x19] ss:$4 sm:$0x3] %vm1888_vm9, %v333_v53  ;;  %v370_v16 = vsel %vm276_vm3, %v267_v3, %v368_v8  ;;  %v372_v17 = vsel %vm279_vm4, %v267_v3, %v368_v8  ;;  %v374_v18 = vsel %vm282_vm5, %v267_v3, %v368_v8  ;;  %v369_v23 = vsel %vm274_vm2, %v267_v3, %v368_v8  ;;  %v1261_v62 = vld [vmem:[%s2544_s3 + $0x390] sm:$0xff]  ;;  %v1290_v10 = vld [vmem:[%s2544_s3 + $0x478] sm:$0xff]  ;;  %v1303_v19 = vld [vmem:[%s2544_s3 + $0x4e0] sm:$0xff] }
  0xa3   :  { %359 = vst.msk [vmem:[#allocation2 + $0x21] ss:$4 sm:$0x3] %vm1888_vm9, %v335_v54  ;;  %v371_v24 = vrot.slane %v370_v16, 1  ;;  %v376_v25 = vsel %vm285_vm6, %v267_v3, %v368_v8  ;;  %v373_v47 = vrot.slane %v372_v17, 2  ;;  %v375_v28 = vrot.slane %v374_v18, 3  ;;  %763 = vmatpush.msrb.mxu3 %v1264_v45  ;;  %666 = vmatpush.msrb.mxu0 %v1211_v46 }
  0xa4   :  { %361 = vst.msk [vmem:[#allocation2 + $0x29] ss:$4 sm:$0x3] %vm1888_vm9, %v337_v57  ;;  %v378_v29 = vsel %vm288_vm7, %v267_v3, %v368_v8  ;;  %v380_v31 = vsel %vm291_vm8, %v267_v3, %v368_v8  ;;  %v382_v32 = vsel %vm294_vm10, %v368_v8, %v267_v3  ;;  %v377_v36 = vrot.slane %v376_v25, 4  ;;  %686 = vmatpush.msrb.mxu1 %v1227_v48  ;;  %v1260_v3 = vld [vmem:[%s2544_s3 + $0x388] sm:$0xff]  ;;  %v1306_v11 = vld [vmem:[%s2544_s3 + $0x4f8] sm:$0xff] }
  0xa5   :  { %363 = vst.msk [vmem:[#allocation2 + $0x31] ss:$4 sm:$0x3] %vm1888_vm9, %v339_v5  ;;  %v379_v38 = vrot.slane %v378_v29, 5  ;;  %v381_v40 = vrot.slane %v380_v31, 6  ;;  %v383_v41 = vrot.slane %v382_v32, 7  ;;  %v412_v42 = vsel %vm276_vm3, %v269_v37, %v410_v30  ;;  %744 = vmatpush.msrb.mxu2 %v1247_v50  ;;  %764 = vmatpush.msrb.mxu3 %v1263_v51 }
  0xa6   :  { %365 = vst.msk [vmem:[#allocation2 + $0x39] ss:$4 sm:$0x3] %vm1888_vm9, %v341_v6  ;;  %v414_v44 = vsel %vm279_vm4, %v269_v37, %v410_v30  ;;  %v416_v49 = vsel %vm282_vm5, %v269_v37, %v410_v30  ;;  %v411_v52 = vsel %vm274_vm2, %v269_v37, %v410_v30  ;;  %v413_v53 = vrot.slane %v412_v42, 1  ;;  %v1243_v5 = vld [vmem:[%s2544_s3 + $0x300] sm:$0xff]  ;;  %v1305_v15 = vld [vmem:[%s2544_s3 + $0x4f0] sm:$0xff] }
  0xa7   :  { %393 = vst.msk [vmem:[#allocation2 + $0x2] ss:$4 sm:$0x3] %vm1888_vm9, %v369_v23  ;;  %v418_v54 = vsel %vm285_vm6, %v269_v37, %v410_v30  ;;  %v415_v57 = vrot.slane %v414_v44, 2  ;;  %v420_v58 = vsel %vm288_vm7, %v269_v37, %v410_v30  ;;  %v417_v60 = vrot.slane %v416_v49, 3  ;;  %745 = vmatpush.msrb.mxu2 %v1246_v55  ;;  %765 = vmatpush.msrb.mxu3 %v1262_v56  ;;  %v1288_v16 = vld [vmem:[%s2544_s3 + $0x468] sm:$0xff] }
  0xa8   :  { %395 = vst.msk [vmem:[#allocation2 + $0xa] ss:$4 sm:$0x3] %vm1888_vm9, %v371_v24  ;;  %v422_v61 = vsel %vm291_vm8, %v269_v37, %v410_v30  ;;  %v419_v63 = vrot.slane %v418_v54, 4  ;;  %v424_v0 = vsel %vm294_vm10, %v410_v30, %v269_v37  ;;  %v421_v2 = vrot.slane %v420_v58, 5  ;;  %v1304_v17 = vld [vmem:[%s2544_s3 + $0x4e8] sm:$0xff] }
  0xa9   :  { %397 = vst.msk [vmem:[#allocation2 + $0x12] ss:$4 sm:$0x3] %vm1888_vm9, %v373_v47  ;;  %746 = vmatpush.msrb.mxu2 %v1245_v59  ;;  %v423_v4 = vrot.slane %v422_v61, 6  ;;  %766 = vmatpush.msrb.mxu3 %v1261_v62  ;;  %v425_v6 = vrot.slane %v424_v0, 7  ;;  %v1287_v18 = vld [vmem:[%s2544_s3 + $0x460] sm:$0xff] }
  0xaa   :  { %399 = vst.msk [vmem:[#allocation2 + $0x1a] ss:$4 sm:$0x3] %vm1888_vm9, %v375_v28  ;;  %v1286_v20 = vld [vmem:[%s2544_s3 + $0x458] sm:$0xff]  ;;  %v1285_v27 = vld [vmem:[%s2544_s3 + $0x450] sm:$0xff]  ;;  %v1284_v30 = vld [vmem:[%s2544_s3 + $0x448] sm:$0xff] }
  0xab   :  { %401 = vst.msk [vmem:[#allocation2 + $0x22] ss:$4 sm:$0x3] %vm1888_vm9, %v377_v36  ;;  %747 = vmatpush.msrb.mxu2 %v1244_v1  ;;  %767 = vmatpush.msrb.mxu3 %v1260_v3  ;;  %v1302_v21 = vld [vmem:[%s2544_s3 + $0x4d8] sm:$0xff]  ;;  %v1301_v47 = vld [vmem:[%s2544_s3 + $0x4d0] sm:$0xff]  ;;  %v1300_v31 = vld [vmem:[%s2544_s3 + $0x4c8] sm:$0xff] }
  0xac   :  { %403 = vst.msk [vmem:[#allocation2 + $0x2a] ss:$4 sm:$0x3] %vm1888_vm9, %v379_v38  ;;  %v1322_v23 = vld [vmem:[%s2544_s3 + $0x578] sm:$0xff]  ;;  %v1321_v28 = vld [vmem:[%s2544_s3 + $0x570] sm:$0xff]  ;;  %v1320_v32 = vld [vmem:[%s2544_s3 + $0x568] sm:$0xff] }
  0xad   :  { %405 = vst.msk [vmem:[#allocation2 + $0x32] ss:$4 sm:$0x3] %vm1888_vm9, %v381_v40  ;;  %748 = vmatpush.msrb.mxu2 %v1243_v5  ;;  %768 = vmatpush.msrb.mxu3 %v1259_v7  ;;  %v1338_v24 = vld [vmem:[%s2544_s3 + $0x5f8] sm:$0xff]  ;;  %v1337_v29 = vld [vmem:[%s2544_s3 + $0x5f0] sm:$0xff]  ;;  %v1336_v33 = vld [vmem:[%s2544_s3 + $0x5e8] sm:$0xff] }
  0xae   :  { %407 = vst.msk [vmem:[#allocation2 + $0x3a] ss:$4 sm:$0x3] %vm1888_vm9, %v383_v41  ;;  %v1283_v34 = vld [vmem:[%s2544_s3 + $0x440] sm:$0xff]  ;;  %v1282_v39 = vld [vmem:[%s2544_s3 + $0x438] sm:$0xff]  ;;  %v1281_v45 = vld [vmem:[%s2544_s3 + $0x430] sm:$0xff] }
  0xaf   :  { %435 = vst.msk [vmem:[#allocation2 + $0x3] ss:$4 sm:$0x3] %vm1888_vm9, %v411_v52  ;;  %v1299_v35 = vld [vmem:[%s2544_s3 + $0x4c0] sm:$0xff]  ;;  %v1298_v40 = vld [vmem:[%s2544_s3 + $0x4b8] sm:$0xff]  ;;  %v1297_v46 = vld [vmem:[%s2544_s3 + $0x4b0] sm:$0xff] }
  0xb0   :  { %437 = vst.msk [vmem:[#allocation2 + $0xb] ss:$4 sm:$0x3] %vm1888_vm9, %v413_v53  ;;  %v1319_v36 = vld [vmem:[%s2544_s3 + $0x560] sm:$0xff]  ;;  %v1318_v43 = vld [vmem:[%s2544_s3 + $0x558] sm:$0xff]  ;;  %v1317_v48 = vld [vmem:[%s2544_s3 + $0x550] sm:$0xff] }
  0xb1   :  { %439 = vst.msk [vmem:[#allocation2 + $0x13] ss:$4 sm:$0x3] %vm1888_vm9, %v415_v57  ;;  %v1335_v37 = vld [vmem:[%s2544_s3 + $0x5e0] sm:$0xff]  ;;  %v1334_v44 = vld [vmem:[%s2544_s3 + $0x5d8] sm:$0xff]  ;;  %v1333_v49 = vld [vmem:[%s2544_s3 + $0x5d0] sm:$0xff] }
  0xb2   :  { %441 = vst.msk [vmem:[#allocation2 + $0x1b] ss:$4 sm:$0x3] %vm1888_vm9, %v417_v60  ;;  %v1280_v50 = vld [vmem:[%s2544_s3 + $0x428] sm:$0xff]  ;;  %v1279_v54 = vld [vmem:[%s2544_s3 + $0x420] sm:$0xff]  ;;  %v1278_v61 = vld [vmem:[%s2544_s3 + $0x418] sm:$0xff] }
  0xb3   :  { %443 = vst.msk [vmem:[#allocation2 + $0x23] ss:$4 sm:$0x3] %vm1888_vm9, %v419_v63  ;;  %v1296_v51 = vld [vmem:[%s2544_s3 + $0x4a8] sm:$0xff]  ;;  %v1295_v55 = vld [vmem:[%s2544_s3 + $0x4a0] sm:$0xff]  ;;  %v1294_v62 = vld [vmem:[%s2544_s3 + $0x498] sm:$0xff] }
  0xb4   :  { %445 = vst.msk [vmem:[#allocation2 + $0x2b] ss:$4 sm:$0x3] %vm1888_vm9, %v421_v2  ;;  %v1316_v52 = vld [vmem:[%s2544_s3 + $0x548] sm:$0xff]  ;;  %v1315_v56 = vld [vmem:[%s2544_s3 + $0x540] sm:$0xff]  ;;  %v1314_v63 = vld [vmem:[%s2544_s3 + $0x538] sm:$0xff] }
  0xb5   :  { %447 = vst.msk [vmem:[#allocation2 + $0x33] ss:$4 sm:$0x3] %vm1888_vm9, %v423_v4  ;;  %v1332_v53 = vld [vmem:[%s2544_s3 + $0x5c8] sm:$0xff]  ;;  %v1331_v57 = vld [vmem:[%s2544_s3 + $0x5c0] sm:$0xff]  ;;  %v1330_v0 = vld [vmem:[%s2544_s3 + $0x5b8] sm:$0xff] }
  0xb6   :  { %449 = vst.msk [vmem:[#allocation2 + $0x3b] ss:$4 sm:$0x3] %vm1888_vm9, %v425_v6  ;;  %v450_v9 = vld [vmem:[#allocation2] sm:$0xff]  ;;  %v1277_v1 = vld [vmem:[%s2544_s3 + $0x410] sm:$0xff] }
  0xb7   :  { %v484_v8 = vld [vmem:[#allocation2 + $0x8] sm:$0xff]  ;;  %v1276_v5 = vld [vmem:[%s2544_s3 + $0x408] sm:$0xff] }
  0xb8   :  { %519 = vst [vmem:[#allocation1] ss:$2 sm:$0xff] %v484_v8  ;;  %v611_v22 = vld [vmem:[#allocation2 + $0x10] sm:$0xff]  ;;  %v1293_v2 = vld [vmem:[%s2544_s3 + $0x490] sm:$0xff]  ;;  %v1292_v6 = vld [vmem:[%s2544_s3 + $0x488] sm:$0xff] }
  0xb9   :  { %v693_v38 = vld [vmem:[#allocation2 + $0x18] sm:$0xff]  ;;  %v1313_v3 = vld [vmem:[%s2544_s3 + $0x530] sm:$0xff]  ;;  %v1312_v8 = vld [vmem:[%s2544_s3 + $0x528] sm:$0xff] }
  0xba   :  { %v775_v58 = vld [vmem:[#allocation2 + $0x20] sm:$0xff]  ;;  %v1329_v4 = vld [vmem:[%s2544_s3 + $0x5b0] sm:$0xff] }
  0xbb   :  { %v857_v7 = vld [vmem:[#allocation2 + $0x28] sm:$0xff] }
  0xbf   :  { %v520_v13 = vld.sshfl [vmem:[#allocation1] sm:$0xff pattern:$0x75316420]  ;;  %v521_v14 = vld.sshfl [vmem:[#allocation1 + $0x8] sm:$0xff pattern:$0x75316420] }
  0xc0   :  { %540 = vmatmul.f32.vlgmr.msra.gmra.mxu0 %v520_v13  ;;  %560 = vmatmul.f32.vlgmr.msra.gmra.mxu1 %v521_v14  ;;  %565 = vst [vmem:[#allocation1] ss:$2 sm:$0xff] %v450_v9  ;;  %v1328_v9 = vld [vmem:[%s2544_s3 + $0x5a8] sm:$0xff]  ;;  %v1311_v13 = vld [vmem:[%s2544_s3 + $0x520] sm:$0xff] }
  0xc1   :  { %815 = vmatpush.msra.mxu0 %v1290_v10  ;;  %835 = vmatpush.msra.mxu1 %v1306_v11  ;;  %v1275_v10 = vld [vmem:[%s2544_s3 + $0x400] sm:$0xff] }
  0xc2   :  { %v1291_v11 = vld [vmem:[%s2544_s3 + $0x480] sm:$0xff] }
  0xc3   :  { %816 = vmatpush.msra.mxu0 %v1289_v12  ;;  %836 = vmatpush.msra.mxu1 %v1305_v15  ;;  %v1327_v14 = vld [vmem:[%s2544_s3 + $0x5a0] sm:$0xff] }
  0xc5   :  { %817 = vmatpush.msra.mxu0 %v1288_v16  ;;  %837 = vmatpush.msra.mxu1 %v1304_v17  ;;  %v1354_v16 = vld [vmem:[%s2544_s3 + $0x678] sm:$0xff] }
  0xc6   :  { %v1370_v17 = vld [vmem:[%s2544_s3 + $0x6f8] sm:$0xff] }
  0xc7   :  { %818 = vmatpush.msra.mxu0 %v1287_v18  ;;  %838 = vmatpush.msra.mxu1 %v1303_v19  ;;  %v566_v25 = vld.sshfl [vmem:[#allocation1] sm:$0xff pattern:$0x75316420]  ;;  %v567_v26 = vld.sshfl [vmem:[#allocation1 + $0x8] sm:$0xff pattern:$0x75316420] }
  0xc8   :  { %586 = vmatmul.f32.vlgmr.msra.gmra.mxu2 %v566_v25  ;;  %606 = vmatmul.f32.vlgmr.msra.gmra.mxu3 %v567_v26  ;;  %646 = vst [vmem:[#allocation1] ss:$2 sm:$0xff] %v611_v22  ;;  %v1310_v18 = vld [vmem:[%s2544_s3 + $0x518] sm:$0xff]  ;;  %v1309_v22 = vld [vmem:[%s2544_s3 + $0x510] sm:$0xff]  ;;  %v1352_v25 = vld [vmem:[%s2544_s3 + $0x668] sm:$0xff] }
  0xc9   :  { %819 = vmatpush.msra.mxu0 %v1286_v20  ;;  %839 = vmatpush.msra.mxu1 %v1302_v21  ;;  %v1326_v19 = vld [vmem:[%s2544_s3 + $0x598] sm:$0xff]  ;;  %v1353_v20 = vld [vmem:[%s2544_s3 + $0x670] sm:$0xff]  ;;  %v1368_v26 = vld [vmem:[%s2544_s3 + $0x6e8] sm:$0xff] }
  0xca   :  { %897 = vmatpush.msra.mxu2 %v1322_v23  ;;  %917 = vmatpush.msra.mxu3 %v1338_v24  ;;  %v1369_v21 = vld [vmem:[%s2544_s3 + $0x6f0] sm:$0xff]  ;;  %v939_v24 = vld [vmem:[#allocation2 + $0x30] sm:$0xff] }
  0xcb   :  { %820 = vmatpush.msra.mxu0 %v1285_v27  ;;  %840 = vmatpush.msra.mxu1 %v1301_v47  ;;  %v1325_v23 = vld [vmem:[%s2544_s3 + $0x590] sm:$0xff]  ;;  %v1308_v27 = vld [vmem:[%s2544_s3 + $0x508] sm:$0xff] }
  0xcc   :  { %898 = vmatpush.msra.mxu2 %v1321_v28  ;;  %918 = vmatpush.msra.mxu3 %v1337_v29  ;;  %v1324_v47 = vld [vmem:[%s2544_s3 + $0x588] sm:$0xff]  ;;  %v1351_v28 = vld [vmem:[%s2544_s3 + $0x660] sm:$0xff] }
  0xcd   :  { %821 = vmatpush.msra.mxu0 %v1284_v30  ;;  %841 = vmatpush.msra.mxu1 %v1300_v31  ;;  %v1367_v29 = vld [vmem:[%s2544_s3 + $0x6e0] sm:$0xff] }
  0xce   :  { %899 = vmatpush.msra.mxu2 %v1320_v32  ;;  %919 = vmatpush.msra.mxu3 %v1336_v33  ;;  %v1307_v32 = vld [vmem:[%s2544_s3 + $0x500] sm:$0xff] }
  0xcf   :  { %822 = vmatpush.msra.mxu0 %v1283_v34  ;;  %842 = vmatpush.msra.mxu1 %v1299_v35  ;;  %v647_v41 = vld.sshfl [vmem:[#allocation1] sm:$0xff pattern:$0x75316420]  ;;  %v648_v42 = vld.sshfl [vmem:[#allocation1 + $0x8] sm:$0xff pattern:$0x75316420] }
  0xd0   :  { %900 = vmatpush.msra.mxu2 %v1319_v36  ;;  %920 = vmatpush.msra.mxu3 %v1335_v37  ;;  %728 = vst [vmem:[#allocation1] ss:$2 sm:$0xff] %v693_v38  ;;  %v1323_v33 = vld [vmem:[%s2544_s3 + $0x580] sm:$0xff]  ;;  %v1350_v34 = vld [vmem:[%s2544_s3 + $0x658] sm:$0xff]  ;;  %v1349_v38 = vld [vmem:[%s2544_s3 + $0x650] sm:$0xff] }
  0xd1   :  { %667 = vmatmul.f32.vlgmr.msrb.gmra.mxu0 %v647_v41  ;;  %687 = vmatmul.f32.vlgmr.msrb.gmra.mxu1 %v648_v42  ;;  %v1366_v35 = vld [vmem:[%s2544_s3 + $0x6d8] sm:$0xff]  ;;  %v1385_v41 = vld [vmem:[%s2544_s3 + $0x770] sm:$0xff] }
  0xd2   :  { %823 = vmatpush.msra.mxu0 %v1282_v39  ;;  %843 = vmatpush.msra.mxu1 %v1298_v40  ;;  %v1386_v36 = vld [vmem:[%s2544_s3 + $0x778] sm:$0xff]  ;;  %v1365_v39 = vld [vmem:[%s2544_s3 + $0x6d0] sm:$0xff]  ;;  %v1021_v40 = vld [vmem:[#allocation2 + $0x38] sm:$0xff] }
  0xd3   :  { %901 = vmatpush.msra.mxu2 %v1318_v43  ;;  %921 = vmatpush.msra.mxu3 %v1334_v44  ;;  %v1402_v37 = vld [vmem:[%s2544_s3 + $0x7f8] sm:$0xff]  ;;  %v1401_v42 = vld [vmem:[%s2544_s3 + $0x7f0] sm:$0xff]  ;;  %v1348_v43 = vld [vmem:[%s2544_s3 + $0x648] sm:$0xff] }
  0xd4   :  { %824 = vmatpush.msra.mxu0 %v1281_v45  ;;  %844 = vmatpush.msra.mxu1 %v1297_v46  ;;  %v1364_v44 = vld [vmem:[%s2544_s3 + $0x6c8] sm:$0xff] }
  0xd5   :  { %902 = vmatpush.msra.mxu2 %v1317_v48  ;;  %922 = vmatpush.msra.mxu3 %v1333_v49  ;;  %v1384_v45 = vld [vmem:[%s2544_s3 + $0x768] sm:$0xff] }
  0xd6   :  { %825 = vmatpush.msra.mxu0 %v1280_v50  ;;  %845 = vmatpush.msra.mxu1 %v1296_v51  ;;  %v1400_v46 = vld [vmem:[%s2544_s3 + $0x7e8] sm:$0xff]  ;;  %v1347_v50 = vld [vmem:[%s2544_s3 + $0x640] sm:$0xff] }
  0xd7   :  { %903 = vmatpush.msra.mxu2 %v1316_v52  ;;  %923 = vmatpush.msra.mxu3 %v1332_v53  ;;  %v729_v59 = vld.sshfl [vmem:[#allocation1] sm:$0xff pattern:$0x75316420]  ;;  %v730_v60 = vld.sshfl [vmem:[#allocation1 + $0x8] sm:$0xff pattern:$0x75316420] }
  0xd8   :  { %826 = vmatpush.msra.mxu0 %v1279_v54  ;;  %846 = vmatpush.msra.mxu1 %v1295_v55  ;;  %810 = vst [vmem:[#allocation1] ss:$2 sm:$0xff] %v775_v58  ;;  %v1363_v51 = vld [vmem:[%s2544_s3 + $0x6c0] sm:$0xff]  ;;  %v1346_v54 = vld [vmem:[%s2544_s3 + $0x638] sm:$0xff]  ;;  %v1345_v58 = vld [vmem:[%s2544_s3 + $0x630] sm:$0xff] }
  0xd9   :  { %904 = vmatpush.msra.mxu2 %v1315_v56  ;;  %924 = vmatpush.msra.mxu3 %v1331_v57  ;;  %v1383_v52 = vld [vmem:[%s2544_s3 + $0x760] sm:$0xff]  ;;  %v1362_v55 = vld [vmem:[%s2544_s3 + $0x6b8] sm:$0xff] }
  0xda   :  { %749 = vmatmul.f32.vlgmr.msrb.gmra.mxu2 %v729_v59  ;;  %769 = vmatmul.f32.vlgmr.msrb.gmra.mxu3 %v730_v60  ;;  %v1399_v53 = vld [vmem:[%s2544_s3 + $0x7e0] sm:$0xff]  ;;  %v1382_v56 = vld [vmem:[%s2544_s3 + $0x758] sm:$0xff]  ;;  %v1361_v59 = vld [vmem:[%s2544_s3 + $0x6b0] sm:$0xff] }
  0xdb   :  { %827 = vmatpush.msra.mxu0 %v1278_v61  ;;  %847 = vmatpush.msra.mxu1 %v1294_v62  ;;  %v1398_v57 = vld [vmem:[%s2544_s3 + $0x7d8] sm:$0xff]  ;;  %v1381_v60 = vld [vmem:[%s2544_s3 + $0x750] sm:$0xff]  ;;  %v1344_v62 = vld [vmem:[%s2544_s3 + $0x628] sm:$0xff] }
  0xdc   :  { %905 = vmatpush.msra.mxu2 %v1314_v63  ;;  %925 = vmatpush.msra.mxu3 %v1330_v0  ;;  %v1397_v61 = vld [vmem:[%s2544_s3 + $0x7d0] sm:$0xff]  ;;  %v1360_v63 = vld [vmem:[%s2544_s3 + $0x6a8] sm:$0xff] }
  0xdd   :  { %828 = vmatpush.msra.mxu0 %v1277_v1  ;;  %848 = vmatpush.msra.mxu1 %v1293_v2  ;;  %v1380_v0 = vld [vmem:[%s2544_s3 + $0x748] sm:$0xff]  ;;  %v1343_v2 = vld [vmem:[%s2544_s3 + $0x620] sm:$0xff] }
  0xde   :  { %906 = vmatpush.msra.mxu2 %v1313_v3  ;;  %926 = vmatpush.msra.mxu3 %v1329_v4  ;;  %v1396_v1 = vld [vmem:[%s2544_s3 + $0x7c8] sm:$0xff]  ;;  %v1359_v3 = vld [vmem:[%s2544_s3 + $0x6a0] sm:$0xff] }
  0xdf   :  { %829 = vmatpush.msra.mxu0 %v1276_v5  ;;  %849 = vmatpush.msra.mxu1 %v1292_v6  ;;  %v811_v12 = vld.sshfl [vmem:[#allocation1] sm:$0xff pattern:$0x75316420]  ;;  %v812_v15 = vld.sshfl [vmem:[#allocation1 + $0x8] sm:$0xff pattern:$0x75316420] }
  0xe0   :  { %907 = vmatpush.msra.mxu2 %v1312_v8  ;;  %927 = vmatpush.msra.mxu3 %v1328_v9  ;;  %892 = vst [vmem:[#allocation1] ss:$2 sm:$0xff] %v857_v7  ;;  %v1379_v4 = vld [vmem:[%s2544_s3 + $0x740] sm:$0xff]  ;;  %v1342_v6 = vld [vmem:[%s2544_s3 + $0x618] sm:$0xff] }
  0xe1   :  { %830 = vmatpush.msra.mxu0 %v1275_v10  ;;  %850 = vmatpush.msra.mxu1 %v1291_v11  ;;  %v1395_v5 = vld [vmem:[%s2544_s3 + $0x7c0] sm:$0xff]  ;;  %v1358_v7 = vld [vmem:[%s2544_s3 + $0x698] sm:$0xff]  ;;  %v1341_v10 = vld [vmem:[%s2544_s3 + $0x610] sm:$0xff] }
  0xe2   :  { %908 = vmatpush.msra.mxu2 %v1311_v13  ;;  %928 = vmatpush.msra.mxu3 %v1327_v14  ;;  %v1378_v8 = vld [vmem:[%s2544_s3 + $0x738] sm:$0xff]  ;;  %v1357_v11 = vld [vmem:[%s2544_s3 + $0x690] sm:$0xff] }
  0xe3   :  { %979 = vmatpush.msrb.mxu0 %v1354_v16  ;;  %999 = vmatpush.msrb.mxu1 %v1370_v17  ;;  %v1394_v9 = vld [vmem:[%s2544_s3 + $0x7b8] sm:$0xff]  ;;  %v1377_v13 = vld [vmem:[%s2544_s3 + $0x730] sm:$0xff]  ;;  %v1376_v16 = vld [vmem:[%s2544_s3 + $0x728] sm:$0xff] }
  0xe4   :  { %831 = vmatmul.f32.vlgmr.msra.gmra.mxu0 %v811_v12  ;;  %851 = vmatmul.f32.vlgmr.msra.gmra.mxu1 %v812_v15  ;;  %v1393_v14 = vld [vmem:[%s2544_s3 + $0x7b0] sm:$0xff]  ;;  %v1340_v12 = vld [vmem:[%s2544_s3 + $0x608] sm:$0xff] }
  0xe5   :  { %909 = vmatpush.msra.mxu2 %v1310_v18  ;;  %929 = vmatpush.msra.mxu3 %v1326_v19  ;;  %v1356_v15 = vld [vmem:[%s2544_s3 + $0x688] sm:$0xff]  ;;  %v1339_v18 = vld [vmem:[%s2544_s3 + $0x600] sm:$0xff] }
  0xe6   :  { %980 = vmatpush.msrb.mxu0 %v1353_v20  ;;  %1000 = vmatpush.msrb.mxu1 %v1369_v21  ;;  %v1392_v17 = vld [vmem:[%s2544_s3 + $0x7a8] sm:$0xff]  ;;  %v1355_v19 = vld [vmem:[%s2544_s3 + $0x680] sm:$0xff] }
  0xe7   :  { %910 = vmatpush.msra.mxu2 %v1309_v22  ;;  %930 = vmatpush.msra.mxu3 %v1325_v23  ;;  %v893_v30 = vld.sshfl [vmem:[#allocation1] sm:$0xff pattern:$0x75316420]  ;;  %v894_v31 = vld.sshfl [vmem:[#allocation1 + $0x8] sm:$0xff pattern:$0x75316420] }
  0xe8   :  { %981 = vmatpush.msrb.mxu0 %v1352_v25  ;;  %1001 = vmatpush.msrb.mxu1 %v1368_v26  ;;  %974 = vst [vmem:[#allocation1] ss:$2 sm:$0xff] %v939_v24  ;;  %v1375_v20 = vld [vmem:[%s2544_s3 + $0x720] sm:$0xff]  ;;  %v1374_v22 = vld [vmem:[%s2544_s3 + $0x718] sm:$0xff]  ;;  %v1373_v24 = vld [vmem:[%s2544_s3 + $0x710] sm:$0xff] }
  0xe9   :  { %911 = vmatpush.msra.mxu2 %v1308_v27  ;;  %931 = vmatpush.msra.mxu3 %v1324_v47  ;;  %v1391_v21 = vld [vmem:[%s2544_s3 + $0x7a0] sm:$0xff]  ;;  %v1390_v23 = vld [vmem:[%s2544_s3 + $0x798] sm:$0xff]  ;;  %v1389_v25 = vld [vmem:[%s2544_s3 + $0x790] sm:$0xff] }
  0xea   :  { %982 = vmatpush.msrb.mxu0 %v1351_v28  ;;  %1002 = vmatpush.msrb.mxu1 %v1367_v29  ;;  %v1372_v26 = vld [vmem:[%s2544_s3 + $0x708] sm:$0xff]  ;;  %v1371_v47 = vld [vmem:[%s2544_s3 + $0x700] sm:$0xff] }
  0xeb   :  { %912 = vmatpush.msra.mxu2 %v1307_v32  ;;  %932 = vmatpush.msra.mxu3 %v1323_v33  ;;  %v1388_v27 = vld [vmem:[%s2544_s3 + $0x788] sm:$0xff]  ;;  %v1387_v28 = vld [vmem:[%s2544_s3 + $0x780] sm:$0xff] }
  0xec   :  { %983 = vmatpush.msrb.mxu0 %v1350_v34  ;;  %1003 = vmatpush.msrb.mxu1 %v1366_v35  ;;  %v1110_v34 = vld [vmem:[%s2546_s5 + $0x10] sm:$0xff]  ;;  %v1109_v35 = vld [vmem:[%s2546_s5 + $0x8] sm:$0xff] }
  0xed   :  { %1061 = vmatpush.msrb.mxu2 %v1386_v36  ;;  %1081 = vmatpush.msrb.mxu3 %v1402_v37  ;;  %v1108_v36 = vld [vmem:[%s2546_s5] sm:$0xff] }
  0xee   :  { %913 = vmatmul.f32.vlgmr.msra.gmra.mxu2 %v893_v30  ;;  %933 = vmatmul.f32.vlgmr.msra.gmra.mxu3 %v894_v31  ;;  %v1111_v31 = vld [vmem:[%s2546_s5 + $0x18] sm:$0xff] }
  0xef   :  { %984 = vmatpush.msrb.mxu0 %v1349_v38  ;;  %1004 = vmatpush.msrb.mxu1 %v1365_v39  ;;  %v2382_v48 = vld.sshfl [vmem:[#allocation1] sm:$0xff pattern:$0x75316420]  ;;  %v2384_v49 = vld.sshfl [vmem:[#allocation1 + $0x8] sm:$0xff pattern:$0x75316420] }
  0xf0   :  { %1062 = vmatpush.msrb.mxu2 %v1385_v41  ;;  %1082 = vmatpush.msrb.mxu3 %v1401_v42  ;;  %1056 = vst [vmem:[#allocation1] ss:$2 sm:$0xff] %v1021_v40 }
  0xf1   :  { %985 = vmatpush.msrb.mxu0 %v1348_v43  ;;  %1005 = vmatpush.msrb.mxu1 %v1364_v44 }
  0xf2   :  { %1063 = vmatpush.msrb.mxu2 %v1384_v45  ;;  %1083 = vmatpush.msrb.mxu3 %v1400_v46 }
  0xf3   :  { %986 = vmatpush.msrb.mxu0 %v1347_v50  ;;  %1006 = vmatpush.msrb.mxu1 %v1363_v51 }
  0xf4   :  { %1064 = vmatpush.msrb.mxu2 %v1383_v52  ;;  %1084 = vmatpush.msrb.mxu3 %v1399_v53 }
  0xf5   :  { %987 = vmatpush.msrb.mxu0 %v1346_v54  ;;  %1007 = vmatpush.msrb.mxu1 %v1362_v55 }
  0xf6   :  { %1065 = vmatpush.msrb.mxu2 %v1382_v56  ;;  %1085 = vmatpush.msrb.mxu3 %v1398_v57 }
  0xf7   :  { %988 = vmatpush.msrb.mxu0 %v1345_v58  ;;  %1008 = vmatpush.msrb.mxu1 %v1361_v59  ;;  %v1057_v29 = vld.sshfl [vmem:[#allocation1] sm:$0xff pattern:$0x75316420]  ;;  %v1058_v30 = vld.sshfl [vmem:[#allocation1 + $0x8] sm:$0xff pattern:$0x75316420] }
  0xf8   :  { %1066 = vmatpush.msrb.mxu2 %v1381_v60  ;;  %1086 = vmatpush.msrb.mxu3 %v1397_v61 }
  0xf9   :  { %989 = vmatpush.msrb.mxu0 %v1344_v62  ;;  %1009 = vmatpush.msrb.mxu1 %v1360_v63 }
  0xfa   :  { %1067 = vmatpush.msrb.mxu2 %v1380_v0  ;;  %1087 = vmatpush.msrb.mxu3 %v1396_v1 }
  0xfb   :  { %990 = vmatpush.msrb.mxu0 %v1343_v2  ;;  %1010 = vmatpush.msrb.mxu1 %v1359_v3  ;;  %v1409_v2 = vld [vmem:[%s2545_s4] ss:$0 sm:$0xff]  ;;  %s1439_s4 = smov 32  }
  0xfc   :  { %1068 = vmatpush.msrb.mxu2 %v1379_v4  ;;  %1088 = vmatpush.msrb.mxu3 %v1395_v5 }
  0xfd   :  { %991 = vmatpush.msrb.mxu0 %v1342_v6  ;;  %1011 = vmatpush.msrb.mxu1 %v1358_v7  ;;  %v1410_v6 = vld [vmem:[%s2547_s6] ss:$0 sm:$0xff] }
  0xfe   :  { %1069 = vmatpush.msrb.mxu2 %v1378_v8  ;;  %1089 = vmatpush.msrb.mxu3 %v1394_v9 }
  0xff   :  { %992 = vmatpush.msrb.mxu0 %v1341_v10  ;;  %1012 = vmatpush.msrb.mxu1 %v1357_v11 }
 0x100   :  { %1070 = vmatpush.msrb.mxu2 %v1377_v13  ;;  %1090 = vmatpush.msrb.mxu3 %v1393_v14 }
 0x101   :  { %993 = vmatpush.msrb.mxu0 %v1340_v12  ;;  %1013 = vmatpush.msrb.mxu1 %v1356_v15 }
 0x102   :  { %1071 = vmatpush.msrb.mxu2 %v1376_v16  ;;  %1091 = vmatpush.msrb.mxu3 %v1392_v17 }
 0x103   :  { %994 = vmatpush.msrb.mxu0 %v1339_v18  ;;  %1014 = vmatpush.msrb.mxu1 %v1355_v19 }
 0x104   :  { %1072 = vmatpush.msrb.mxu2 %v1375_v20  ;;  %1092 = vmatpush.msrb.mxu3 %v1391_v21 }
 0x105   :  { %995 = vmatmul.f32.vlgmr.msrb.gmra.mxu0 %v2382_v48  ;;  %1015 = vmatmul.f32.vlgmr.msrb.gmra.mxu1 %v2384_v49 }
 0x106   :  { %1073 = vmatpush.msrb.mxu2 %v1374_v22  ;;  %1093 = vmatpush.msrb.mxu3 %v1390_v23 }
 0x107   :  { %1132 = vmatpush.msra.mxu0 %v1111_v31 }
 0x108   :  { %1074 = vmatpush.msrb.mxu2 %v1373_v24  ;;  %1094 = vmatpush.msrb.mxu3 %v1389_v25 }
 0x109   :  { %1133 = vmatpush.msra.mxu0 %v1110_v34 }
 0x10a   :  { %1075 = vmatpush.msrb.mxu2 %v1372_v26  ;;  %1095 = vmatpush.msrb.mxu3 %v1388_v27 }
 0x10b   :  { %1134 = vmatpush.msra.mxu0 %v1109_v35 }
 0x10c   :  { %1076 = vmatpush.msrb.mxu2 %v1371_v47  ;;  %1096 = vmatpush.msrb.mxu3 %v1387_v28 }
 0x10d   :  { %1077 = vmatmul.f32.vlgmr.msrb.gmra.mxu2 %v1057_v29  ;;  %1097 = vmatmul.f32.vlgmr.msrb.gmra.mxu3 %v1058_v30 }
 0x10e   :  { %1135 = vmatpush.msra.mxu0 %v1108_v36 }
 0x13d   :  { %v541_v32 = vpop.f32.mrf.mxu0  ;;  %v561_v33 = vpop.f32.mrf.mxu1 }
 0x13e   :  { %v562_v41 = vadd.f32 %v561_v33, %v541_v32 }
 0x14b   :  { %v587_v37 = vpop.f32.mrf.mxu2  ;;  %v607_v38 = vpop.f32.mrf.mxu3 }
 0x14c   :  { %v588_v42 = vadd.f32 %v587_v37, %v562_v41 }
 0x14e   :  { %v668_v39 = vpop.f32.mrf.mxu0  ;;  %v688_v40 = vpop.f32.mrf.mxu1  ;;  %v608_v48 = vadd.f32 %v607_v38, %v588_v42 }
 0x14f   :  { %v689_v49 = vadd.f32 %v688_v40, %v668_v39 }
 0x151   :  { %v691_v51 = vadd.f32 %v689_v49, %v608_v48 }
 0x15d   :  { %v750_v43 = vpop.f32.mrf.mxu2  ;;  %v770_v44 = vpop.f32.mrf.mxu3 }
 0x15e   :  { %v771_v50 = vadd.f32 %v770_v44, %v750_v43 }
 0x160   :  { %v773_v54 = vadd.f32 %v771_v50, %v691_v51 }
 0x161   :  { %v832_v45 = vpop.f32.mrf.mxu0  ;;  %v852_v46 = vpop.f32.mrf.mxu1 }
 0x162   :  { %v853_v55 = vadd.f32 %v852_v46, %v832_v45 }
 0x164   :  { %v855_v59 = vadd.f32 %v853_v55, %v773_v54 }
 0x171   :  { %v914_v52 = vpop.f32.mrf.mxu2  ;;  %v934_v53 = vpop.f32.mrf.mxu3 }
 0x172   :  { %v935_v58 = vadd.f32 %v934_v53, %v914_v52 }
 0x174   :  { %v937_v61 = vadd.f32 %v935_v58, %v855_v59 }
 0x182   :  { %v996_v56 = vpop.f32.mrf.mxu0  ;;  %v1016_v57 = vpop.f32.mrf.mxu1 }
 0x183   :  { %v1017_v60 = vadd.f32 %v1016_v57, %v996_v56 }
 0x185   :  { %v1019_v0 = vadd.f32 %v1017_v60, %v937_v61 }
 0x190   :  { %v1078_v62 = vpop.f32.mrf.mxu2  ;;  %v1098_v63 = vpop.f32.mrf.mxu3 }
 0x191   :  { %v1099_v1 = vadd.f32 %v1098_v63, %v1078_v62 }
 0x193   :  { %v1101_v3 = vadd.f32 %v1099_v1, %v1019_v0 }
 0x195   :  { %v1106_v4 = vadd.f32 %v1409_v2, %v1101_v3 }
 0x197   :  { %v1107_v5 = vmax.f32 %v1106_v4, 0.0 }
 0x199   :  { %1403 = vmatmul.msk.f32.vlgmr.msra.gmra.mxu0 %vm1116_vm11, %v1107_v5 }
 0x216   :  { %v1137_v7 = vpop.f32.mrf.mxu0 }
 0x217   :  { %v1138_v8 = vadd.f32 %v1410_v6, %v1137_v7 }
 0x219   :  { %1141 = vst.msk [vmem:[#allocation3] sm:$0x3] %vm1140_vm12, %v1138_v8 }
 0x21a   :  { %1144 = vst.msk [vmem:[#allocation3] sm:$0xc] %vm1143_vm13, %v1138_v8 }
 0x21b   :  { %1157 = dma.vmem_to_hbm [thread:$0]  %s1150_s16, 64, %s1152_s19, [#allocation4], %s1439_s4, %s1439_s4, %s1440_s20  }
 0x21c   :  { %1435 = dma.done.wait [#allocation4], 64  }
 0x21d   :  { %1436 = vsyncadd [#allocation4], 4294967232 }
 0x21e   :  { %1162 = vsyncpa [#allocation4], 1 }

</bundles_post_ra>
